<compile_context>
chip_gen: v7x
topology: tpu7x:2x2x1
jax: 0.10.0
libtpu: 0.0.40
codegen_flags: <defaults>
</compile_context>

<pallas_src>
import numpy as np
import jax
import jax.numpy as jnp
from jax.experimental import pallas as pl
from jax.experimental.pallas import tpu as pltpu

_VMEM_LIMIT = 32 * 1024 * 1024  # safe scoped-VMEM budget on v5e/v6e/v7x


# ---------------------------------------------------------------------------
# Kernels
# ---------------------------------------------------------------------------

def _conv3x3_stats_kernel(xb_ref, w_ref, b_ref, y_ref, stats_ref):
    """3x3 'same' conv on one halo'd row band + bias, plus per-tile BN stats.

    xb_ref   : (TILE_H + 2, W + 2, Cin)  bf16  -- padded, halo'd input band
    w_ref    : (9, Cin, Cpad)            bf16  -- (dy, dx)-major filter taps
    b_ref    : (1, Cpad)                 f32
    y_ref    : (TILE_H, W, Cpad)         bf16  -- raw conv + bias (pre-BN)
    stats_ref: (1, 2, Cpad)              f32   -- per-tile [sum, sum_sq] from f32 acc
    """
    tile_h, out_w, cpad = y_ref.shape
    cin = xb_ref.shape[-1]
    ks = xb_ref.shape[0] - tile_h + 1                      # = 3

    band = xb_ref[...]                                     # (TILE_H+2, W+2, Cin)
    acc = jnp.zeros((tile_h * out_w, cpad), jnp.float32)
    for dy in range(ks):
        for dx in range(ks):
            xm = band[dy:dy + tile_h, dx:dx + out_w, :].reshape(tile_h * out_w, cin)
            acc = acc + jnp.dot(xm, w_ref[dy * ks + dx],
                                preferred_element_type=jnp.float32)
    acc = acc + b_ref[...]                                 # (1, Cpad) broadcast

    y_ref[...] = acc.reshape(tile_h, out_w, cpad).astype(y_ref.dtype)
    s = jnp.sum(acc, axis=0, keepdims=True)                # (1, Cpad)
    ss = jnp.sum(acc * acc, axis=0, keepdims=True)         # (1, Cpad)
    stats_ref[...] = jnp.concatenate([s, ss], axis=0)[None]


def _scale_shift_relu_kernel(y_ref, scale_ref, shift_ref, o_ref):
    """Fused BN apply (per-channel FMA, f32) + ReLU.  Dropout2d(p=0) is identity."""
    y = y_ref[...].astype(jnp.float32)
    o_ref[...] = jnp.maximum(y * scale_ref[...] + shift_ref[...], 0.0)


def _matmul_bias_kernel(x_ref, w_ref, b_ref, o_ref):
    """Tiled (TILE_M, K) @ (K, N) + bias, used for the 2x2 up/down convolutions."""
    o_ref[...] = (jnp.dot(x_ref[...], w_ref[...],
                          preferred_element_type=jnp.float32) + b_ref[...])


# ---------------------------------------------------------------------------
# Wrappers
# ---------------------------------------------------------------------------

def _pick_row_tile(H, W, cin, cpad, budget_bytes=12 * 1024 * 1024):
    """Largest divisor-of-H row tile whose working set fits a VMEM budget."""
    cands = sorted({d for d in (8, 16, 32, 64, 128, 256, H) if H % d == 0})
    best = cands[0]
    for th in cands:
        band = 2 * (th + 2) * (W + 2) * cin * 2      # double-buffered bf16 input band
        yout = 2 * th * W * cpad * 2                 # double-buffered bf16 output tile
        accb = th * W * cpad * 4                     # f32 accumulator
        if band + yout + accb <= budget_bytes:
            best = th
    return best


def _pointwise_conv_matmul(x2d, w2d, b_row):
    """(M, K) @ (K, N) + bias as a gridded Pallas matmul (tiny 2x2 convs)."""
    M, K = x2d.shape
    Nc = w2d.shape[1]
    tile_m = 128 if (M % 128 == 0) else M
    return pl.pallas_call(
        _matmul_bias_kernel,
        grid=(M // tile_m,),
        in_specs=[
            pl.BlockSpec((tile_m, K), lambda i: (i, 0)),
            pl.BlockSpec((K, Nc), lambda i: (0, 0)),
            pl.BlockSpec((1, Nc), lambda i: (0, 0)),
        ],
        out_specs=pl.BlockSpec((tile_m, Nc), lambda i: (i, 0)),
        out_shape=jax.ShapeDtypeStruct((M, Nc), jnp.float32),
        compiler_params=pltpu.CompilerParams(
            dimension_semantics=("parallel",),
            vmem_limit_bytes=_VMEM_LIMIT),
    )(x2d, w2d, b_row)


def conv3x3_bn_relu(x_nhwc, weight, bias, gamma, beta, *, eps=1e-5):
    """unetConv2 (n=1): Conv2d(3x3, s=1, p=1) + BatchNorm2d(train) + Dropout(0) + ReLU.

    x_nhwc: (N, H, W, Cin) f32.  weight: (Cout, Cin, 3, 3).  Returns (N, H, W, Cout).
    """
    N, H, W, Cin = x_nhwc.shape
    Cout, cin_w, ksz, ksz2 = weight.shape
    assert cin_w == Cin and ksz == ksz2 == 3
    pad = ksz // 2
    Cpad = ((Cout + 127) // 128) * 128            # lane-dense output channels
    tile_h = _pick_row_tile(H, W, Cin, Cpad)
    RB = H // tile_h

    # Halo'd, padded bf16 row bands: (N, RB, tile_h + 2, W + 2, Cin).
    # Only (tile_h + 2)/tile_h input duplication (vs. 3x for stacked dy-shifts).
    # TODO(synk): reach exactly 1x HBM input traffic by DMA-ing halo'd bands
    #             straight from HBM (memory_space=pl.ANY + pltpu.make_async_copy).
    xp = jnp.pad(x_nhwc.astype(jnp.bfloat16),
                 ((0, 0), (pad, pad), (pad, pad), (0, 0)))
    if RB == 1:
        xb = xp[:, None]
    else:
        xb = jnp.stack([xp[:, rb * tile_h: rb * tile_h + tile_h + 2 * pad]
                        for rb in range(RB)], axis=1)

    # (Cout, Cin, kh, kw) -> (kh*kw, Cin, Cpad), zero-padded output channels.
    w = jnp.transpose(weight, (2, 3, 1, 0)).reshape(ksz * ksz, Cin, Cout)
    w = jnp.pad(w, ((0, 0), (0, 0), (0, Cpad - Cout))).astype(jnp.bfloat16)
    b = jnp.pad(bias, (0, Cpad - Cout)).reshape(1, Cpad).astype(jnp.float32)

    # ---- pass 1: conv-as-matmul + per-tile (sum, sum_sq) ---------------------
    y_raw, stats = pl.pallas_call(
        _conv3x3_stats_kernel,
        grid=(N, RB),
        in_specs=[
            pl.BlockSpec((None, None, tile_h + 2 * pad, W + 2 * pad, Cin),
                         lambda n, rb: (n, rb, 0, 0, 0)),
            pl.BlockSpec((ksz * ksz, Cin, Cpad), lambda n, rb: (0, 0, 0)),
            pl.BlockSpec((1, Cpad), lambda n, rb: (0, 0)),
        ],
        out_specs=[
            pl.BlockSpec((None, tile_h, W, Cpad), lambda n, rb: (n, rb, 0, 0)),
            pl.BlockSpec((1, 2, Cpad), lambda n, rb: (n * RB + rb, 0, 0)),
        ],
        out_shape=[
            jax.ShapeDtypeStruct((N, H, W, Cpad), jnp.bfloat16),
            jax.ShapeDtypeStruct((N * RB, 2, Cpad), jnp.float32),
        ],
        compiler_params=pltpu.CompilerParams(
            dimension_semantics=("parallel", "parallel"),
            vmem_limit_bytes=_VMEM_LIMIT),
    )(xb, w, b)

    # ---- tiny cross-tile reduction, fold BN into per-channel scale/shift -----
    m = N * H * W
    total = jnp.sum(stats[:, 0, :], axis=0)
    total_sq = jnp.sum(stats[:, 1, :], axis=0)
    mean = total / m
    var = total_sq / m - mean * mean              # biased variance (BN training mode)
    gamma_p = jnp.pad(gamma, (0, Cpad - Cout), constant_values=1.0)
    beta_p = jnp.pad(beta, (0, Cpad - Cout))
    rstd = jax.lax.rsqrt(var + eps)
    scale = (gamma_p * rstd).reshape(1, 1, Cpad).astype(jnp.float32)
    shift = (beta_p - mean * gamma_p * rstd).reshape(1, 1, Cpad).astype(jnp.float32)

    # ---- pass 2: lane-dense fused scale/shift + ReLU -------------------------
    out = pl.pallas_call(
        _scale_shift_relu_kernel,
        grid=(N, RB),
        in_specs=[
            pl.BlockSpec((None, tile_h, W, Cpad), lambda n, rb: (n, rb, 0, 0)),
            pl.BlockSpec((1, 1, Cpad), lambda n, rb: (0, 0, 0)),
            pl.BlockSpec((1, 1, Cpad), lambda n, rb: (0, 0, 0)),
        ],
        out_specs=pl.BlockSpec((None, tile_h, W, Cpad), lambda n, rb: (n, rb, 0, 0)),
        out_shape=jax.ShapeDtypeStruct((N, H, W, Cpad), jnp.float32),
        compiler_params=pltpu.CompilerParams(
            dimension_semantics=("parallel", "parallel"),
            vmem_limit_bytes=_VMEM_LIMIT),
    )(y_raw, scale, shift)

    return out[:, :, :, :Cout]


def up_convtranspose2x2(x_nchw, weight, bias):
    """PyTorch ConvTranspose2d(Cin, Cout, kernel_size=2, stride=2, padding=0).

    weight: (Cin, Cout, 2, 2).  Returns NHWC (N, 2H, 2W, Cout).  With k=2/s=2 every
    output pixel has exactly one contributing input pixel, so this is a per-pixel
    matmul followed by a 2x2 pixel shuffle.
    """
    N, Cin, Hh, Wh = x_nchw.shape
    Cout = weight.shape[1]
    x = jnp.transpose(x_nchw, (0, 2, 3, 1)).reshape(N * Hh * Wh, Cin).astype(jnp.float32)
    w = jnp.transpose(weight, (0, 2, 3, 1)).reshape(Cin, 4 * Cout).astype(jnp.float32)
    b = jnp.tile(bias.astype(jnp.float32), 4).reshape(1, 4 * Cout)
    y = _pointwise_conv_matmul(x, w, b)                      # (N*Hh*Wh, 4*Cout)
    y = y.reshape(N, Hh, Wh, 2, 2, Cout)                     # (n, i, j, di, dj, co)
    y = jnp.transpose(y, (0, 1, 3, 2, 4, 5)).reshape(N, 2 * Hh, 2 * Wh, Cout)
    return y


def down_conv2x2_s2(x_nchw, weight, bias):
    """PyTorch Conv2d(Cin, Cout, kernel_size=2, stride=2, padding=0).

    weight: (Cout, Cin, 2, 2).  Returns NHWC (N, H/2, W/2, Cout).
    Non-overlapping 2x2 windows -> space-to-depth + per-pixel matmul.
    """
    N, Cin, H2, W2 = x_nchw.shape
    Cout = weight.shape[0]
    H, W = H2 // 2, W2 // 2
    x = jnp.transpose(x_nchw, (0, 2, 3, 1)).reshape(N, H, 2, W, 2, Cin)
    x = jnp.transpose(x, (0, 1, 3, 2, 4, 5)).reshape(N * H * W, 4 * Cin).astype(jnp.float32)
    w = jnp.transpose(weight, (2, 3, 1, 0)).reshape(4 * Cin, Cout).astype(jnp.float32)
    b = bias.reshape(1, Cout).astype(jnp.float32)
    y = _pointwise_conv_matmul(x, w, b)                      # (N*H*W, Cout)
    return y.reshape(N, H, W, Cout)


def unet_up_forward(down_feature, up_feature, same_feature, params, *, eps=1e-5):
    """Forward of `unetUp`: up-conv, down-conv, channel concat, then unetConv2."""
    up_nhwc = up_convtranspose2x2(up_feature, params["up_w"], params["up_b"])
    down_nhwc = down_conv2x2_s2(down_feature, params["down_w"], params["down_b"])
    same_nhwc = jnp.transpose(same_feature, (0, 2, 3, 1)).astype(jnp.float32)
    cat = jnp.concatenate([up_nhwc, same_nhwc, down_nhwc], axis=-1)
    out_nhwc = conv3x3_bn_relu(cat, params["conv_w"], params["conv_b"],
                               params["bn_gamma"], params["bn_beta"], eps=eps)
    return jnp.transpose(out_nhwc, (0, 3, 1, 2))             # back to NCHW


# ---------------------------------------------------------------------------
# Pure-XLA reference (same semantics as the PyTorch module forward)
# ---------------------------------------------------------------------------

def reference_forward(down_feature, up_feature, same_feature, params, eps=1e-5):
    hp = jax.lax.Precision.HIGHEST
    # ConvTranspose2d(k=2, s=2, p=0) == lhs-dilated conv with swapped+flipped kernel.
    wt = params["up_w"]                                      # (Cin, Cout, 2, 2)
    w_t = jnp.transpose(wt, (1, 0, 2, 3))[:, :, ::-1, ::-1]
    up = jax.lax.conv_general_dilated(
        up_feature, w_t, window_strides=(1, 1), padding=((1, 1), (1, 1)),
        lhs_dilation=(2, 2), dimension_numbers=("NCHW", "OIHW", "NCHW"),
        precision=hp)
    up = up + params["up_b"][None, :, None, None]

    down = jax.lax.conv_general_dilated(
        down_feature, params["down_w"], window_strides=(2, 2),
        padding=((0, 0), (0, 0)), dimension_numbers=("NCHW", "OIHW", "NCHW"),
        precision=hp)
    down = down + params["down_b"][None, :, None, None]

    x = jnp.concatenate([up, same_feature, down], axis=1)

    y = jax.lax.conv_general_dilated(
        x, params["conv_w"], window_strides=(1, 1), padding=((1, 1), (1, 1)),
        dimension_numbers=("NCHW", "OIHW", "NCHW"), precision=hp)
    y = y + params["conv_b"][None, :, None, None]
    mean = jnp.mean(y, axis=(0, 2, 3), keepdims=True)
    var = jnp.mean((y - mean) ** 2, axis=(0, 2, 3), keepdims=True)
    y = (y - mean) * jax.lax.rsqrt(var + eps) * params["bn_gamma"][None, :, None, None] \
        + params["bn_beta"][None, :, None, None]
    return jnp.maximum(y, 0.0)


if __name__ == "__main__":
    keys = jax.random.split(jax.random.PRNGKey(0), 10)

    # Small demo shapes for unetUp(c=4):
    #   down_feature (N, c/2, 2H, 2W), up_feature (N, 2c, H/2, W/2),
    #   same_feature (N, c, H, W)  ->  output (N, c, H, W)
    N, c, H, W = 2, 4, 16, 16
    c_half, c2 = c // 2, 2 * c
    cin_cat = c_half + c2 + c                                # = 14

    down_feature = jax.random.normal(keys[0], (N, c_half, 2 * H, 2 * W), jnp.float32)
    up_feature = jax.random.normal(keys[1], (N, c2, H // 2, W // 2), jnp.float32)
    same_feature = jax.random.normal(keys[2], (N, c, H, W), jnp.float32)

    params = {
        "up_w": 0.1 * jax.random.normal(keys[3], (c2, c2, 2, 2), jnp.float32),
        "up_b": 0.1 * jax.random.normal(keys[4], (c2,), jnp.float32),
        "down_w": 0.1 * jax.random.normal(keys[5], (c_half, c_half, 2, 2), jnp.float32),
        "down_b": 0.1 * jax.random.normal(keys[6], (c_half,), jnp.float32),
        "conv_w": 0.1 * jax.random.normal(keys[7], (c, cin_cat, 3, 3), jnp.float32),
        "conv_b": 0.1 * jax.random.normal(keys[8], (c,), jnp.float32),
        "bn_gamma": jnp.ones((c,), jnp.float32),             # BatchNorm2d defaults
        "bn_beta": jnp.zeros((c,), jnp.float32),
    }

    fwd = jax.jit(unet_up_forward)
    out = jax.block_until_ready(fwd(down_feature, up_feature, same_feature, params))
    assert out.shape == (N, c, H, W), out.shape

    ref = jax.block_until_ready(
        reference_forward(down_feature, up_feature, same_feature, params))
    # Tolerance reflects bf16 MXU inputs / bf16 pre-BN intermediate vs. f32 reference.
    np.testing.assert_allclose(np.asarray(out), np.asarray(ref), rtol=2e-2, atol=2e-2)

    print("KERNEL_OK")
</pallas_src>

<mosaic_0001>
module attributes {stable_mosaic.version = 11 : i64} {
  func.func @_matmul_bias_kernel(%arg0: i32, %arg1: memref<128x8xf32, #tpu.memory_space<vmem>>, %arg2: memref<8x2xf32, #tpu.memory_space<vmem>>, %arg3: memref<1x2xf32, #tpu.memory_space<vmem>>, %arg4: memref<128x2xf32, #tpu.memory_space<vmem>>) attributes {dimension_semantics = [#tpu.dimension_semantics<parallel>], iteration_bounds = array<i64: 4>, scalar_prefetch = 0 : i64, scratch_operands = 0 : i64, tpu.core_type = #tpu.core_type<tc>, window_params = [{transform_indices = @transform_0, window_bounds = array<i64: 128, 8>}, {pipeline_mode = #tpu.pipeline_mode<synchronous>, transform_indices = @transform_1, window_bounds = array<i64: 8, 2>}, {pipeline_mode = #tpu.pipeline_mode<synchronous>, transform_indices = @transform_2, window_bounds = array<i64: 1, 2>}, {transform_indices = @transform_3, window_bounds = array<i64: 128, 2>}]} {
    %c0 = arith.constant 0 : index
    %c0_0 = arith.constant 0 : index
    %0 = vector.load %arg1[%c0, %c0_0] : memref<128x8xf32, #tpu.memory_space<vmem>>, vector<128x8xf32>
    %c0_1 = arith.constant 0 : index
    %c0_2 = arith.constant 0 : index
    %1 = vector.load %arg2[%c0_1, %c0_2] : memref<8x2xf32, #tpu.memory_space<vmem>>, vector<8x2xf32>
    %cst = arith.constant dense<0.000000e+00> : vector<128x2xf32>
    %2 = tpu.matmul %0, %1, %cst {dimension_numbers = #tpu.dot_dimension_numbers<[1], [0], [0], [1], [0, 0, 1, 1], [], []>} : vector<128x8xf32>, vector<8x2xf32>, vector<128x2xf32> -> vector<128x2xf32>
    %c0_3 = arith.constant 0 : index
    %c0_4 = arith.constant 0 : index
    %3 = vector.load %arg3[%c0_3, %c0_4] : memref<1x2xf32, #tpu.memory_space<vmem>>, vector<1x2xf32>
    %4 = vector.broadcast %3 : vector<1x2xf32> to vector<128x2xf32>
    %5 = arith.addf %2, %4 : vector<128x2xf32>
    %c0_5 = arith.constant 0 : index
    %c0_6 = arith.constant 0 : index
    %6 = vector.load %arg4[%c0_5, %c0_6] : memref<128x2xf32, #tpu.memory_space<vmem>>, vector<128x2xf32>
    tpu.vector_store %arg4[%c0_5, %c0_6], %5 {strides = array<i32>} : memref<128x2xf32, #tpu.memory_space<vmem>>, vector<128x2xf32>,
    return
  }
  func.func @transform_0(%arg0: i32) -> (i32, i32) {
    %c0_i32 = arith.constant 0 : i32
    %c0_i32_0 = arith.constant 0 : i32
    return %arg0, %c0_i32 : i32, i32
  }
  func.func @transform_1(%arg0: i32) -> (i32, i32) {
    %c0_i32 = arith.constant 0 : i32
    %c0_i32_0 = arith.constant 0 : i32
    %c0_i32_1 = arith.constant 0 : i32
    return %c0_i32, %c0_i32_0 : i32, i32
  }
  func.func @transform_2(%arg0: i32) -> (i32, i32) {
    %c0_i32 = arith.constant 0 : i32
    %c0_i32_0 = arith.constant 0 : i32
    %c0_i32_1 = arith.constant 0 : i32
    return %c0_i32, %c0_i32_0 : i32, i32
  }
  func.func @transform_3(%arg0: i32) -> (i32, i32) {
    %c0_i32 = arith.constant 0 : i32
    %c0_i32_0 = arith.constant 0 : i32
    return %arg0, %c0_i32 : i32, i32
  }
}

module attributes {stable_mosaic.version = 11 : i64} {
  func.func @_matmul_bias_kernel(%arg0: i32, %arg1: memref<128x8xf32, #tpu.memory_space<vmem>>, %arg2: memref<8x32xf32, #tpu.memory_space<vmem>>, %arg3: memref<1x32xf32, #tpu.memory_space<vmem>>, %arg4: memref<128x32xf32, #tpu.memory_space<vmem>>) attributes {dimension_semantics = [#tpu.dimension_semantics<parallel>], iteration_bounds = array<i64: 1>, scalar_prefetch = 0 : i64, scratch_operands = 0 : i64, tpu.core_type = #tpu.core_type<tc>, window_params = [{transform_indices = @transform_0, window_bounds = array<i64: 128, 8>}, {pipeline_mode = #tpu.pipeline_mode<synchronous>, transform_indices = @transform_1, window_bounds = array<i64: 8, 32>}, {pipeline_mode = #tpu.pipeline_mode<synchronous>, transform_indices = @transform_2, window_bounds = array<i64: 1, 32>}, {transform_indices = @transform_3, window_bounds = array<i64: 128, 32>}]} {
    %c0 = arith.constant 0 : index
    %c0_0 = arith.constant 0 : index
    %0 = vector.load %arg1[%c0, %c0_0] : memref<128x8xf32, #tpu.memory_space<vmem>>, vector<128x8xf32>
    %c0_1 = arith.constant 0 : index
    %c0_2 = arith.constant 0 : index
    %1 = vector.load %arg2[%c0_1, %c0_2] : memref<8x32xf32, #tpu.memory_space<vmem>>, vector<8x32xf32>
    %cst = arith.constant dense<0.000000e+00> : vector<128x32xf32>
    %2 = tpu.matmul %0, %1, %cst {dimension_numbers = #tpu.dot_dimension_numbers<[1], [0], [0], [1], [0, 0, 1, 1], [], []>} : vector<128x8xf32>, vector<8x32xf32>, vector<128x32xf32> -> vector<128x32xf32>
    %c0_3 = arith.constant 0 : index
    %c0_4 = arith.constant 0 : index
    %3 = vector.load %arg3[%c0_3, %c0_4] : memref<1x32xf32, #tpu.memory_space<vmem>>, vector<1x32xf32>
    %4 = vector.broadcast %3 : vector<1x32xf32> to vector<128x32xf32>
    %5 = arith.addf %2, %4 : vector<128x32xf32>
    %c0_5 = arith.constant 0 : index
    %c0_6 = arith.constant 0 : index
    %6 = vector.load %arg4[%c0_5, %c0_6] : memref<128x32xf32, #tpu.memory_space<vmem>>, vector<128x32xf32>
    tpu.vector_store %arg4[%c0_5, %c0_6], %5 {strides = array<i32>} : memref<128x32xf32, #tpu.memory_space<vmem>>, vector<128x32xf32>,
    return
  }
  func.func @transform_0(%arg0: i32) -> (i32, i32) {
    %c0_i32 = arith.constant 0 : i32
    %c0_i32_0 = arith.constant 0 : i32
    return %arg0, %c0_i32 : i32, i32
  }
  func.func @transform_1(%arg0: i32) -> (i32, i32) {
    %c0_i32 = arith.constant 0 : i32
    %c0_i32_0 = arith.constant 0 : i32
    %c0_i32_1 = arith.constant 0 : i32
    return %c0_i32, %c0_i32_0 : i32, i32
  }
  func.func @transform_2(%arg0: i32) -> (i32, i32) {
    %c0_i32 = arith.constant 0 : i32
    %c0_i32_0 = arith.constant 0 : i32
    %c0_i32_1 = arith.constant 0 : i32
    return %c0_i32, %c0_i32_0 : i32, i32
  }
  func.func @transform_3(%arg0: i32) -> (i32, i32) {
    %c0_i32 = arith.constant 0 : i32
    %c0_i32_0 = arith.constant 0 : i32
    return %arg0, %c0_i32 : i32, i32
  }
}

module attributes {stable_mosaic.version = 11 : i64} {
  func.func @_conv3x3_stats_kernel(%arg0: i32, %arg1: i32, %arg2: memref<1x1x18x18x14xbf16, #tpu.memory_space<vmem>>, %arg3: memref<9x14x128xbf16, #tpu.memory_space<vmem>>, %arg4: memref<1x128xf32, #tpu.memory_space<vmem>>, %arg5: memref<1x16x16x128xbf16, #tpu.memory_space<vmem>>, %arg6: memref<1x2x128xf32, #tpu.memory_space<vmem>>) attributes {dimension_semantics = [#tpu.dimension_semantics<parallel>, #tpu.dimension_semantics<parallel>], iteration_bounds = array<i64: 2, 1>, scalar_prefetch = 0 : i64, scratch_operands = 0 : i64, tpu.core_type = #tpu.core_type<tc>, window_params = [{transform_indices = @transform_0, window_bounds = array<i64: 1, 1, 18, 18, 14>}, {pipeline_mode = #tpu.pipeline_mode<synchronous>, transform_indices = @transform_1, window_bounds = array<i64: 9, 14, 128>}, {pipeline_mode = #tpu.pipeline_mode<synchronous>, transform_indices = @transform_2, window_bounds = array<i64: 1, 128>}, {transform_indices = @transform_3, window_bounds = array<i64: 1, 16, 16, 128>}, {transform_indices = @transform_4, window_bounds = array<i64: 1, 2, 128>}]} {
    %c0 = arith.constant 0 : index
    %c0_0 = arith.constant 0 : index
    %c0_1 = arith.constant 0 : index
    %c0_2 = arith.constant 0 : index
    %c0_3 = arith.constant 0 : index
    %0 = vector.load %arg2[%c0, %c0_0, %c0_1, %c0_2, %c0_3] : memref<1x1x18x18x14xbf16, #tpu.memory_space<vmem>>, vector<1x1x18x18x14xbf16>
    %1 = vector.shape_cast %0 : vector<1x1x18x18x14xbf16> to vector<18x18x14xbf16>
    %cst = arith.constant 0.000000e+00 : f32
    %2 = vector.broadcast %cst : f32 to vector<256x128xf32>
    %3 = vector.extract_strided_slice %1 {offsets = [0, 0, 0], sizes = [16, 16, 14], strides = [1, 1, 1]} : vector<18x18x14xbf16> to vector<16x16x14xbf16>
    %4 = vector.shape_cast %3 : vector<16x16x14xbf16> to vector<256x14xbf16>
    %c0_4 = arith.constant 0 : index
    %c0_5 = arith.constant 0 : index
    %c0_6 = arith.constant 0 : index
    %5 = vector.load %arg3[%c0_4, %c0_5, %c0_6] : memref<9x14x128xbf16, #tpu.memory_space<vmem>>, vector<1x14x128xbf16>
    %6 = vector.shape_cast %5 : vector<1x14x128xbf16> to vector<14x128xbf16>
    %cst_7 = arith.constant dense<0.000000e+00> : vector<256x128xf32>
    %7 = tpu.matmul %4, %6, %cst_7 {dimension_numbers = #tpu.dot_dimension_numbers<[1], [0], [0], [1], [0, 0, 1, 1], [], []>} : vector<256x14xbf16>, vector<14x128xbf16>, vector<256x128xf32> -> vector<256x128xf32>
    %8 = arith.addf %2, %7 : vector<256x128xf32>
    %9 = vector.extract_strided_slice %1 {offsets = [0, 1, 0], sizes = [16, 16, 14], strides = [1, 1, 1]} : vector<18x18x14xbf16> to vector<16x16x14xbf16>
    %10 = vector.shape_cast %9 : vector<16x16x14xbf16> to vector<256x14xbf16>
    %c1 = arith.constant 1 : index
    %c0_8 = arith.constant 0 : index
    %c0_9 = arith.constant 0 : index
    %11 = vector.load %arg3[%c1, %c0_8, %c0_9] : memref<9x14x128xbf16, #tpu.memory_space<vmem>>, vector<1x14x128xbf16>
    %12 = vector.shape_cast %11 : vector<1x14x128xbf16> to vector<14x128xbf16>
    %cst_10 = arith.constant dense<0.000000e+00> : vector<256x128xf32>
    %13 = tpu.matmul %10, %12, %cst_10 {dimension_numbers = #tpu.dot_dimension_numbers<[1], [0], [0], [1], [0, 0, 1, 1], [], []>} : vector<256x14xbf16>, vector<14x128xbf16>, vector<256x128xf32> -> vector<256x128xf32>
    %14 = arith.addf %8, %13 : vector<256x128xf32>
    %15 = vector.extract_strided_slice %1 {offsets = [0, 2, 0], sizes = [16, 16, 14], strides = [1, 1, 1]} : vector<18x18x14xbf16> to vector<16x16x14xbf16>
    %16 = vector.shape_cast %15 : vector<16x16x14xbf16> to vector<256x14xbf16>
    %c2 = arith.constant 2 : index
    %c0_11 = arith.constant 0 : index
    %c0_12 = arith.constant 0 : index
    %17 = vector.load %arg3[%c2, %c0_11, %c0_12] : memref<9x14x128xbf16, #tpu.memory_space<vmem>>, vector<1x14x128xbf16>
    %18 = vector.shape_cast %17 : vector<1x14x128xbf16> to vector<14x128xbf16>
    %cst_13 = arith.constant dense<0.000000e+00> : vector<256x128xf32>
    %19 = tpu.matmul %16, %18, %cst_13 {dimension_numbers = #tpu.dot_dimension_numbers<[1], [0], [0], [1], [0, 0, 1, 1], [], []>} : vector<256x14xbf16>, vector<14x128xbf16>, vector<256x128xf32> -> vector<256x128xf32>
    %20 = arith.addf %14, %19 : vector<256x128xf32>
    %21 = vector.extract_strided_slice %1 {offsets = [1, 0, 0], sizes = [16, 16, 14], strides = [1, 1, 1]} : vector<18x18x14xbf16> to vector<16x16x14xbf16>
    %22 = vector.shape_cast %21 : vector<16x16x14xbf16> to vector<256x14xbf16>
    %c3 = arith.constant 3 : index
    %c0_14 = arith.constant 0 : index
    %c0_15 = arith.constant 0 : index
    %23 = vector.load %arg3[%c3, %c0_14, %c0_15] : memref<9x14x128xbf16, #tpu.memory_space<vmem>>, vector<1x14x128xbf16>
    %24 = vector.shape_cast %23 : vector<1x14x128xbf16> to vector<14x128xbf16>
    %cst_16 = arith.constant dense<0.000000e+00> : vector<256x128xf32>
    %25 = tpu.matmul %22, %24, %cst_16 {dimension_numbers = #tpu.dot_dimension_numbers<[1], [0], [0], [1], [0, 0, 1, 1], [], []>} : vector<256x14xbf16>, vector<14x128xbf16>, vector<256x128xf32> -> vector<256x128xf32>
    %26 = arith.addf %20, %25 : vector<256x128xf32>
    %27 = vector.extract_strided_slice %1 {offsets = [1, 1, 0], sizes = [16, 16, 14], strides = [1, 1, 1]} : vector<18x18x14xbf16> to vector<16x16x14xbf16>
    %28 = vector.shape_cast %27 : vector<16x16x14xbf16> to vector<256x14xbf16>
    %c4 = arith.constant 4 : index
    %c0_17 = arith.constant 0 : index
    %c0_18 = arith.constant 0 : index
    %29 = vector.load %arg3[%c4, %c0_17, %c0_18] : memref<9x14x128xbf16, #tpu.memory_space<vmem>>, vector<1x14x128xbf16>
    %30 = vector.shape_cast %29 : vector<1x14x128xbf16> to vector<14x128xbf16>
    %cst_19 = arith.constant dense<0.000000e+00> : vector<256x128xf32>
    %31 = tpu.matmul %28, %30, %cst_19 {dimension_numbers = #tpu.dot_dimension_numbers<[1], [0], [0], [1], [0, 0, 1, 1], [], []>} : vector<256x14xbf16>, vector<14x128xbf16>, vector<256x128xf32> -> vector<256x128xf32>
    %32 = arith.addf %26, %31 : vector<256x128xf32>
    %33 = vector.extract_strided_slice %1 {offsets = [1, 2, 0], sizes = [16, 16, 14], strides = [1, 1, 1]} : vector<18x18x14xbf16> to vector<16x16x14xbf16>
    %34 = vector.shape_cast %33 : vector<16x16x14xbf16> to vector<256x14xbf16>
    %c5 = arith.constant 5 : index
    %c0_20 = arith.constant 0 : index
    %c0_21 = arith.constant 0 : index
    %35 = vector.load %arg3[%c5, %c0_20, %c0_21] : memref<9x14x128xbf16, #tpu.memory_space<vmem>>, vector<1x14x128xbf16>
    %36 = vector.shape_cast %35 : vector<1x14x128xbf16> to vector<14x128xbf16>
    %cst_22 = arith.constant dense<0.000000e+00> : vector<256x128xf32>
    %37 = tpu.matmul %34, %36, %cst_22 {dimension_numbers = #tpu.dot_dimension_numbers<[1], [0], [0], [1], [0, 0, 1, 1], [], []>} : vector<256x14xbf16>, vector<14x128xbf16>, vector<256x128xf32> -> vector<256x128xf32>
    %38 = arith.addf %32, %37 : vector<256x128xf32>
    %39 = vector.extract_strided_slice %1 {offsets = [2, 0, 0], sizes = [16, 16, 14], strides = [1, 1, 1]} : vector<18x18x14xbf16> to vector<16x16x14xbf16>
    %40 = vector.shape_cast %39 : vector<16x16x14xbf16> to vector<256x14xbf16>
    %c6 = arith.constant 6 : index
    %c0_23 = arith.constant 0 : index
    %c0_24 = arith.constant 0 : index
    %41 = vector.load %arg3[%c6, %c0_23, %c0_24] : memref<9x14x128xbf16, #tpu.memory_space<vmem>>, vector<1x14x128xbf16>
    %42 = vector.shape_cast %41 : vector<1x14x128xbf16> to vector<14x128xbf16>
    %cst_25 = arith.constant dense<0.000000e+00> : vector<256x128xf32>
    %43 = tpu.matmul %40, %42, %cst_25 {dimension_numbers = #tpu.dot_dimension_numbers<[1], [0], [0], [1], [0, 0, 1, 1], [], []>} : vector<256x14xbf16>, vector<14x128xbf16>, vector<256x128xf32> -> vector<256x128xf32>
    %44 = arith.addf %38, %43 : vector<256x128xf32>
    %45 = vector.extract_strided_slice %1 {offsets = [2, 1, 0], sizes = [16, 16, 14], strides = [1, 1, 1]} : vector<18x18x14xbf16> to vector<16x16x14xbf16>
    %46 = vector.shape_cast %45 : vector<16x16x14xbf16> to vector<256x14xbf16>
    %c7 = arith.constant 7 : index
    %c0_26 = arith.constant 0 : index
    %c0_27 = arith.constant 0 : index
    %47 = vector.load %arg3[%c7, %c0_26, %c0_27] : memref<9x14x128xbf16, #tpu.memory_space<vmem>>, vector<1x14x128xbf16>
    %48 = vector.shape_cast %47 : vector<1x14x128xbf16> to vector<14x128xbf16>
    %cst_28 = arith.constant dense<0.000000e+00> : vector<256x128xf32>
    %49 = tpu.matmul %46, %48, %cst_28 {dimension_numbers = #tpu.dot_dimension_numbers<[1], [0], [0], [1], [0, 0, 1, 1], [], []>} : vector<256x14xbf16>, vector<14x128xbf16>, vector<256x128xf32> -> vector<256x128xf32>
    %50 = arith.addf %44, %49 : vector<256x128xf32>
    %51 = vector.extract_strided_slice %1 {offsets = [2, 2, 0], sizes = [16, 16, 14], strides = [1, 1, 1]} : vector<18x18x14xbf16> to vector<16x16x14xbf16>
    %52 = vector.shape_cast %51 : vector<16x16x14xbf16> to vector<256x14xbf16>
    %c8 = arith.constant 8 : index
    %c0_29 = arith.constant 0 : index
    %c0_30 = arith.constant 0 : index
    %53 = vector.load %arg3[%c8, %c0_29, %c0_30] : memref<9x14x128xbf16, #tpu.memory_space<vmem>>, vector<1x14x128xbf16>
    %54 = vector.shape_cast %53 : vector<1x14x128xbf16> to vector<14x128xbf16>
    %cst_31 = arith.constant dense<0.000000e+00> : vector<256x128xf32>
    %55 = tpu.matmul %52, %54, %cst_31 {dimension_numbers = #tpu.dot_dimension_numbers<[1], [0], [0], [1], [0, 0, 1, 1], [], []>} : vector<256x14xbf16>, vector<14x128xbf16>, vector<256x128xf32> -> vector<256x128xf32>
    %56 = arith.addf %50, %55 : vector<256x128xf32>
    %c0_32 = arith.constant 0 : index
    %c0_33 = arith.constant 0 : index
    %57 = vector.load %arg4[%c0_32, %c0_33] : memref<1x128xf32, #tpu.memory_space<vmem>>, vector<1x128xf32>
    %58 = vector.broadcast %57 : vector<1x128xf32> to vector<256x128xf32>
    %59 = arith.addf %56, %58 : vector<256x128xf32>
    %60 = vector.shape_cast %59 : vector<256x128xf32> to vector<16x16x128xf32>
    %61 = arith.truncf %60 : vector<16x16x128xf32> to vector<16x16x128xbf16>
    %c0_34 = arith.constant 0 : index
    %c0_35 = arith.constant 0 : index
    %c0_36 = arith.constant 0 : index
    %c0_37 = arith.constant 0 : index
    %62 = vector.load %arg5[%c0_34, %c0_35, %c0_36, %c0_37] : memref<1x16x16x128xbf16, #tpu.memory_space<vmem>>, vector<1x16x16x128xbf16>
    %63 = vector.shape_cast %62 : vector<1x16x16x128xbf16> to vector<16x16x128xbf16>
    %64 = vector.shape_cast %61 : vector<16x16x128xbf16> to vector<1x16x16x128xbf16>
    tpu.vector_store %arg5[%c0_34, %c0_35, %c0_36, %c0_37], %64 {strides = array<i32>} : memref<1x16x16x128xbf16, #tpu.memory_space<vmem>>, vector<1x16x16x128xbf16>,
    %cst_38 = arith.constant dense<0.000000e+00> : vector<128xf32>
    %65 = vector.multi_reduction <add>, %59, %cst_38 [0] : vector<256x128xf32> to vector<128xf32>
    %66 = vector.shape_cast %65 : vector<128xf32> to vector<1x128xf32>
    %67 = arith.mulf %59, %59 : vector<256x128xf32>
    %cst_39 = arith.constant dense<0.000000e+00> : vector<128xf32>
    %68 = vector.multi_reduction <add>, %67, %cst_39 [0] : vector<256x128xf32> to vector<128xf32>
    %69 = vector.shape_cast %68 : vector<128xf32> to vector<1x128xf32>
    %70 = tpu.concatenate %66, %69 in 0 : vector<1x128xf32>, vector<1x128xf32> -> vector<2x128xf32>
    %71 = vector.shape_cast %70 : vector<2x128xf32> to vector<1x2x128xf32>
    %c0_40 = arith.constant 0 : index
    %c0_41 = arith.constant 0 : index
    %c0_42 = arith.constant 0 : index
    %72 = vector.load %arg6[%c0_40, %c0_41, %c0_42] : memref<1x2x128xf32, #tpu.memory_space<vmem>>, vector<1x2x128xf32>
    tpu.vector_store %arg6[%c0_40, %c0_41, %c0_42], %71 {strides = array<i32>} : memref<1x2x128xf32, #tpu.memory_space<vmem>>, vector<1x2x128xf32>,
    return
  }
  func.func @transform_0(%arg0: i32, %arg1: i32) -> (i32, i32, i32, i32, i32) {
    %c0_i32 = arith.constant 0 : i32
    %c0_i32_0 = arith.constant 0 : i32
    %c0_i32_1 = arith.constant 0 : i32
    %c0_i32_2 = arith.constant 0 : i32
    return %arg0, %arg1, %c0_i32, %c0_i32_0, %c0_i32_1 : i32, i32, i32, i32, i32
  }
  func.func @transform_1(%arg0: i32, %arg1: i32) -> (i32, i32, i32) {
    %c0_i32 = arith.constant 0 : i32
    %c0_i32_0 = arith.constant 0 : i32
    %c0_i32_1 = arith.constant 0 : i32
    %c0_i32_2 = arith.constant 0 : i32
    return %c0_i32, %c0_i32_0, %c0_i32_1 : i32, i32, i32
  }
  func.func @transform_2(%arg0: i32, %arg1: i32) -> (i32, i32) {
    %c0_i32 = arith.constant 0 : i32
    %c0_i32_0 = arith.constant 0 : i32
    %c0_i32_1 = arith.constant 0 : i32
    return %c0_i32, %c0_i32_0 : i32, i32
  }
  func.func @transform_3(%arg0: i32, %arg1: i32) -> (i32, i32, i32, i32) {
    %c0_i32 = arith.constant 0 : i32
    %c0_i32_0 = arith.constant 0 : i32
    %c0_i32_1 = arith.constant 0 : i32
    return %arg0, %arg1, %c0_i32, %c0_i32_0 : i32, i32, i32, i32
  }
  func.func @transform_4(%arg0: i32, %arg1: i32) -> (i32, i32, i32) {
    %c1_i32 = arith.constant 1 : i32
    %0 = arith.muli %arg0, %c1_i32 : i32
    %1 = arith.addi %0, %arg1 : i32
    %c0_i32 = arith.constant 0 : i32
    %c0_i32_0 = arith.constant 0 : i32
    %c0_i32_1 = arith.constant 0 : i32
    return %1, %c0_i32, %c0_i32_0 : i32, i32, i32
  }
}

module attributes {stable_mosaic.version = 11 : i64} {
  func.func @_scale_shift_relu_kernel(%arg0: i32, %arg1: i32, %arg2: memref<1x16x16x128xbf16, #tpu.memory_space<vmem>>, %arg3: memref<1x1x128xf32, #tpu.memory_space<vmem>>, %arg4: memref<1x1x128xf32, #tpu.memory_space<vmem>>, %arg5: memref<1x16x16x128xf32, #tpu.memory_space<vmem>>) attributes {dimension_semantics = [#tpu.dimension_semantics<parallel>, #tpu.dimension_semantics<parallel>], iteration_bounds = array<i64: 2, 1>, scalar_prefetch = 0 : i64, scratch_operands = 0 : i64, tpu.core_type = #tpu.core_type<tc>, window_params = [{transform_indices = @transform_0, window_bounds = array<i64: 1, 16, 16, 128>}, {pipeline_mode = #tpu.pipeline_mode<synchronous>, transform_indices = @transform_1, window_bounds = array<i64: 1, 1, 128>}, {pipeline_mode = #tpu.pipeline_mode<synchronous>, transform_indices = @transform_2, window_bounds = array<i64: 1, 1, 128>}, {transform_indices = @transform_3, window_bounds = array<i64: 1, 16, 16, 128>}]} {
    %c0 = arith.constant 0 : index
    %c0_0 = arith.constant 0 : index
    %c0_1 = arith.constant 0 : index
    %c0_2 = arith.constant 0 : index
    %0 = vector.load %arg2[%c0, %c0_0, %c0_1, %c0_2] : memref<1x16x16x128xbf16, #tpu.memory_space<vmem>>, vector<1x16x16x128xbf16>
    %1 = vector.shape_cast %0 : vector<1x16x16x128xbf16> to vector<16x16x128xbf16>
    %2 = arith.extf %1 : vector<16x16x128xbf16> to vector<16x16x128xf32>
    %c0_3 = arith.constant 0 : index
    %c0_4 = arith.constant 0 : index
    %c0_5 = arith.constant 0 : index
    %3 = vector.load %arg3[%c0_3, %c0_4, %c0_5] : memref<1x1x128xf32, #tpu.memory_space<vmem>>, vector<1x1x128xf32>
    %4 = vector.broadcast %3 : vector<1x1x128xf32> to vector<16x16x128xf32>
    %5 = arith.mulf %2, %4 : vector<16x16x128xf32>
    %c0_6 = arith.constant 0 : index
    %c0_7 = arith.constant 0 : index
    %c0_8 = arith.constant 0 : index
    %6 = vector.load %arg4[%c0_6, %c0_7, %c0_8] : memref<1x1x128xf32, #tpu.memory_space<vmem>>, vector<1x1x128xf32>
    %7 = vector.broadcast %6 : vector<1x1x128xf32> to vector<16x16x128xf32>
    %8 = arith.addf %5, %7 : vector<16x16x128xf32>
    %cst = arith.constant 0.000000e+00 : f32
    %9 = vector.broadcast %cst : f32 to vector<16x16x128xf32>
    %10 = arith.maximumf %8, %9 : vector<16x16x128xf32>
    %c0_9 = arith.constant 0 : index
    %c0_10 = arith.constant 0 : index
    %c0_11 = arith.constant 0 : index
    %c0_12 = arith.constant 0 : index
    %11 = vector.load %arg5[%c0_9, %c0_10, %c0_11, %c0_12] : memref<1x16x16x128xf32, #tpu.memory_space<vmem>>, vector<1x16x16x128xf32>
    %12 = vector.shape_cast %11 : vector<1x16x16x128xf32> to vector<16x16x128xf32>
    %13 = vector.shape_cast %10 : vector<16x16x128xf32> to vector<1x16x16x128xf32>
    tpu.vector_store %arg5[%c0_9, %c0_10, %c0_11, %c0_12], %13 {strides = array<i32>} : memref<1x16x16x128xf32, #tpu.memory_space<vmem>>, vector<1x16x16x128xf32>,
    return
  }
  func.func @transform_0(%arg0: i32, %arg1: i32) -> (i32, i32, i32, i32) {
    %c0_i32 = arith.constant 0 : i32
    %c0_i32_0 = arith.constant 0 : i32
    %c0_i32_1 = arith.constant 0 : i32
    return %arg0, %arg1, %c0_i32, %c0_i32_0 : i32, i32, i32, i32
  }
  func.func @transform_1(%arg0: i32, %arg1: i32) -> (i32, i32, i32) {
    %c0_i32 = arith.constant 0 : i32
    %c0_i32_0 = arith.constant 0 : i32
    %c0_i32_1 = arith.constant 0 : i32
    %c0_i32_2 = arith.constant 0 : i32
    return %c0_i32, %c0_i32_0, %c0_i32_1 : i32, i32, i32
  }
  func.func @transform_2(%arg0: i32, %arg1: i32) -> (i32, i32, i32) {
    %c0_i32 = arith.constant 0 : i32
    %c0_i32_0 = arith.constant 0 : i32
    %c0_i32_1 = arith.constant 0 : i32
    %c0_i32_2 = arith.constant 0 : i32
    return %c0_i32, %c0_i32_0, %c0_i32_1 : i32, i32, i32
  }
  func.func @transform_3(%arg0: i32, %arg1: i32) -> (i32, i32, i32, i32) {
    %c0_i32 = arith.constant 0 : i32
    %c0_i32_0 = arith.constant 0 : i32
    %c0_i32_1 = arith.constant 0 : i32
    return %arg0, %arg1, %c0_i32, %c0_i32_0 : i32, i32, i32, i32
  }
}

</mosaic_0001>

<bundles_post_ra>
// kernel: tile.8
= control target key start
LH: loop header
LB: loop body
LE: loop exit
PB: predicated region body
PF: predicated region fallthrough
CT: control target
= control target key end

     0   :  { %s22_s0 = inlined_call_operand.vmem [shape: f32[8], index: 0, kind: input, shape index: {}]   ;;  %s23_s1 = inlined_call_operand.vmem [shape: f32[4,8], index: 1, kind: output, shape index: {}]  }
   0x1   :  { %v4_v0 = vld [vmem:[%s22_s0] ss:$0 sm:$0xff] }
   0x2   :  { %5 = vst [vmem:[%s23_s1] sm:$0xf] %v4_v0 }

// kernel: tile.9
= control target key start
LH: loop header
LB: loop body
LE: loop exit
PB: predicated region body
PF: predicated region fallthrough
CT: control target
= control target key end

     0   :  { %vm7_vm0 = vcmask 64512   ;;  %s37_s8 = smov 8   ;;  %s38_s9 = smov 16   ;;  %vm13_vm1 = vcmask 261312   ;;  %vm19_vm2 = vcmask 195712   ;;  %vm25_vm3 = vcmask 130112   ;;  %s55_s0 = inlined_call_operand.vmem [shape: f32[4,8], index: 0, kind: input, shape index: {}]   ;;  %s56_s1 = inlined_call_operand.vmem [shape: f32[1,32], index: 1, kind: output, shape index: {}]  }
   0x1   :  { %v4_v0 = vld [vmem:[%s55_s0] sm:$0xf]  ;;  %s36_s0 = smov 24  }
   0x2   :  { %5 = vst [vmem:[#allocation1] sm:$0xf] %v4_v0 }
   0x9   :  { %v10_v1 = vld [vmem:[#allocation1 + $0x3] sm:$0x1]   ;;  %v22_v2 = vld [vmem:[#allocation1 + $0x1] sm:$0x1]   ;;  %v6_v3 = vld [vmem:[#allocation1] sm:$0x1]  }
   0xa   :  { %11 = vrot.lane.b32.xlu0 %v10_v1, %s36_s0  ;;  %23 = vrot.lane.b32.xlu1 %v22_v2, %s37_s8  ;;  %v16_v4 = vld [vmem:[#allocation1 + $0x2] sm:$0x1]   ;;  %8 = vst.msk [vmem:[#allocation0] sm:$0x1] %vm7_vm0, %v6_v3  }
   0xe   :  { %17 = vrot.lane.b32.xlu0 %v16_v4, %s38_s9 }
  0x7c   :  { %v12_v5 = vpop.permute.xlu0 %11   ;;  %v24_v6 = vpop.permute.xlu1 %23  }
  0x7d   :  { %14 = vst.msk [vmem:[#allocation0] sm:$0x1] %vm13_vm1, %v12_v5  }
  0x80   :  { %v18_v7 = vpop.permute.xlu0 %17  }
  0x81   :  { %20 = vst.msk [vmem:[#allocation0] sm:$0x1] %vm19_vm2, %v18_v7  }
  0x82   :  { %26 = vst.msk [vmem:[#allocation0] sm:$0x1] %vm25_vm3, %v24_v6  }
  0x89   :  { %v30_v8 = vld [vmem:[#allocation0] sm:$0x1] }
  0x8a   :  { %32 = vst [vmem:[%s56_s1] sm:$0x1] %v30_v8 }

// kernel: unet_up_forward.5
= control target key start
LH: loop header
LB: loop body
LE: loop exit
PB: predicated region body
PF: predicated region fallthrough
CT: control target
= control target key end

     0   :  { %s574_s12 = smov 0   ;;  %s654_s0 = inlined_call_operand.vmem [shape: f32[512,8], index: 0, kind: input, shape index: {}]   ;;  %s655_s1 = inlined_call_operand.vmem [shape: f32[8,2], index: 1, kind: input, shape index: {}]   ;;  %s656_s2 = inlined_call_operand.vmem [shape: f32[1,2], index: 2, kind: input, shape index: {}]   ;;  %s657_s3 = inlined_call_operand.vmem [shape: f32[512,2], index: 3, kind: output, shape index: {}]  }
   0x1 LB: > { %s465_s13 = sadd.s32 4294967295, %s552_s12   ;;  %p469_p0 = scmp.ge.s32.totalorder %s552_s12, 1  ;;  %s552_s12 = sphi %s574_s12, %s13_s12  }
   0x2   : > { %p138_p1 = scmp.lt.s32.totalorder %s552_s12, 5 }
   0x4   : > { %p139_p2 = pnand %p469_p0, %p138_p1 }
   0x5   : > { %v190_v0 = vld [vmem:[%s655_s1] sm:$0xff] (!%p139_p2)  ;;  %s470_s16 = sshll.u32 (!%p139_p2), %s465_s13, 4  ;;  %vm198_vm0 = vcmask (!%p139_p2), 64512   ;;  %vm392_vm1 = vcmask (!%p139_p2), 15360  }
   0x6   : > { %142 = sbr.rel (%p139_p2) target bundleno = 247 (0xf7), region = 32  ;;  %510 = vmatprep.subr.mxu0 (!%p139_p2), %v190_v0  ;;  %536 = vmatprep.subr.mxu1 (!%p139_p2), %v190_v0  ;;  %p163_p3 = scmp.lt.s32.totalorder (!%p139_p2), %s470_s16, 63  ;;  %v474_v17 = vld [vmem:[%s656_s2] ss:$0 sm:$0xff] (!%p139_p2) }
   0x7   : > { %511 = vmatpush3.msra.mxu0 (!%p139_p2), %v190_v0  ;;  %537 = vmatpush3.msra.mxu1 (!%p139_p2), %v190_v0 }
   0xd   : > { %s659_s16 = smov (!%p163_p3, %s470_s16), 63 }
   0xe   : > { %s471_s17 = sshll.u32 %s659_s16, 3 }
   0xf   : > { %s166_s20 = scalar_lea.vmem %s654_s0, %s471_s17  ;;  %s617_s25 = scalar_lea.vmem %s657_s3, %s471_s17 }
  0x10   : > { %v174_v1 = vld [vmem:[%s166_s20] sm:$0xff]  ;;  %v175_v3 = vld [vmem:[%s166_s20 + $0x8] sm:$0xff]  ;;  %v176_v5 = vld [vmem:[%s166_s20 + $0x10] sm:$0xff] }
  0x11   : > { %v182_v2 = vld [vmem:[%s166_s20 + $0x40] sm:$0xff]  ;;  %512 = vmatprep.mubr.msk.f32.mxu0 %vm198_vm0, %v174_v1  ;;  %v183_v4 = vld [vmem:[%s166_s20 + $0x48] sm:$0xff]  ;;  %v184_v6 = vld [vmem:[%s166_s20 + $0x50] sm:$0xff] }
  0x12   : > { %524 = vmatprep.mubr.msk.f32.mxu1 %vm198_vm0, %v182_v2  ;;  %513 = vmatmul.mubr.msk.f32.vlgmr.msra.gmra.mrb[0].mxu0 %vm198_vm0, %v175_v3  ;;  %v177_v7 = vld [vmem:[%s166_s20 + $0x18] sm:$0xff]  ;;  %v178_v9 = vld [vmem:[%s166_s20 + $0x20] sm:$0xff]  ;;  %v179_v11 = vld [vmem:[%s166_s20 + $0x28] sm:$0xff] }
  0x13   : > { %525 = vmatmul.mubr.msk.f32.vlgmr.msra.gmra.mrb[0].mxu1 %vm198_vm0, %v183_v4  ;;  %515 = vmatprep.mubr.msk.f32.mxu0 %vm198_vm0, %v176_v5  ;;  %v185_v8 = vld [vmem:[%s166_s20 + $0x58] sm:$0xff]  ;;  %v186_v10 = vld [vmem:[%s166_s20 + $0x60] sm:$0xff]  ;;  %v187_v12 = vld [vmem:[%s166_s20 + $0x68] sm:$0xff] }
  0x14   : > { %527 = vmatprep.mubr.msk.f32.mxu1 %vm198_vm0, %v184_v6  ;;  %v180_v13 = vld [vmem:[%s166_s20 + $0x30] sm:$0xff]  ;;  %v181_v15 = vld [vmem:[%s166_s20 + $0x38] sm:$0xff] }
  0x15   : > { %v188_v14 = vld [vmem:[%s166_s20 + $0x70] sm:$0xff]  ;;  %v189_v16 = vld [vmem:[%s166_s20 + $0x78] sm:$0xff] }
  0x16   : > { %516 = vmatmul.mubr.msk.f32.gmra.mrb[2].mxu0 %vm198_vm0, %v177_v7 }
  0x17   : > { %528 = vmatmul.mubr.msk.f32.gmra.mrb[2].mxu1 %vm198_vm0, %v185_v8  ;;  %518 = vmatprep.mubr.msk.f32.mxu0 %vm198_vm0, %v178_v9 }
  0x18   : > { %530 = vmatprep.mubr.msk.f32.mxu1 %vm198_vm0, %v186_v10 }
  0x1a   : > { %519 = vmatmul.mubr.msk.f32.gmra.mrb[4].mxu0 %vm198_vm0, %v179_v11 }
  0x1b   : > { %531 = vmatmul.mubr.msk.f32.gmra.mrb[4].mxu1 %vm198_vm0, %v187_v12  ;;  %521 = vmatprep.mubr.msk.f32.mxu0 %vm198_vm0, %v180_v13 }
  0x1c   : > { %533 = vmatprep.mubr.msk.f32.mxu1 %vm198_vm0, %v188_v14 }
  0x1e   : > { %522 = vmatmul.mubr.msk.f32.gmra.mrb[6].mxu0 %vm198_vm0, %v181_v15 }
  0x1f   : > { %534 = vmatmul.mubr.msk.f32.gmra.mrb[6].mxu1 %vm198_vm0, %v189_v16 }
  0xe5   : > { %v514_v18 = vpop.f32.mrb[0].mxu0 }
  0xe6   : > { %v526_v19 = vpop.f32.mrb[0].mxu1  ;;  %v319_v20 = vadd.f32 %v514_v18, %v474_v17  ;;  %v313_v22 = vpop.f32.mrb[1].mxu0 }
  0xe7   : > { %v359_v21 = vadd.f32 %v526_v19, %v474_v17  ;;  %v353_v23 = vpop.f32.mrb[1].mxu1  ;;  %v314_v24 = vadd.f32 %v474_v17, %v313_v22 }
  0xe8   : > { %v354_v25 = vadd.f32 %v474_v17, %v353_v23  ;;  %394 = vst.msk [vmem:[%s617_s25 + $0x8] sm:$0xff] %vm392_vm1, %v319_v20 }
  0xe9   : > { %402 = vst.msk [vmem:[%s617_s25 + $0x48] sm:$0xff] %vm392_vm1, %v359_v21  ;;  %393 = vst.msk [vmem:[%s617_s25] sm:$0xff] %vm392_vm1, %v314_v24  ;;  %v517_v26 = vpop.f32.mrb[2].mxu0 }
  0xea   : > { %401 = vst.msk [vmem:[%s617_s25 + $0x40] sm:$0xff] %vm392_vm1, %v354_v25  ;;  %v529_v27 = vpop.f32.mrb[2].mxu1  ;;  %v329_v28 = vadd.f32 %v517_v26, %v474_v17  ;;  %v323_v30 = vpop.f32.mrb[3].mxu0 }
  0xeb   : > { %v369_v29 = vadd.f32 %v529_v27, %v474_v17  ;;  %v363_v31 = vpop.f32.mrb[3].mxu1  ;;  %v324_v32 = vadd.f32 %v474_v17, %v323_v30 }
  0xec   : > { %v364_v33 = vadd.f32 %v474_v17, %v363_v31  ;;  %396 = vst.msk [vmem:[%s617_s25 + $0x18] sm:$0xff] %vm392_vm1, %v329_v28 }
  0xed   : > { %404 = vst.msk [vmem:[%s617_s25 + $0x58] sm:$0xff] %vm392_vm1, %v369_v29  ;;  %395 = vst.msk [vmem:[%s617_s25 + $0x10] sm:$0xff] %vm392_vm1, %v324_v32  ;;  %v520_v34 = vpop.f32.mrb[4].mxu0 }
  0xee   : > { %403 = vst.msk [vmem:[%s617_s25 + $0x50] sm:$0xff] %vm392_vm1, %v364_v33  ;;  %v532_v35 = vpop.f32.mrb[4].mxu1  ;;  %v339_v36 = vadd.f32 %v520_v34, %v474_v17  ;;  %v333_v38 = vpop.f32.mrb[5].mxu0 }
  0xef   : > { %v379_v37 = vadd.f32 %v532_v35, %v474_v17  ;;  %v373_v39 = vpop.f32.mrb[5].mxu1  ;;  %v334_v40 = vadd.f32 %v474_v17, %v333_v38 }
  0xf0   : > { %v374_v41 = vadd.f32 %v474_v17, %v373_v39  ;;  %398 = vst.msk [vmem:[%s617_s25 + $0x28] sm:$0xff] %vm392_vm1, %v339_v36 }
  0xf1   : > { %406 = vst.msk [vmem:[%s617_s25 + $0x68] sm:$0xff] %vm392_vm1, %v379_v37  ;;  %397 = vst.msk [vmem:[%s617_s25 + $0x20] sm:$0xff] %vm392_vm1, %v334_v40  ;;  %v523_v42 = vpop.f32.mrb[6].mxu0 }
  0xf2   : > { %405 = vst.msk [vmem:[%s617_s25 + $0x60] sm:$0xff] %vm392_vm1, %v374_v41  ;;  %v535_v43 = vpop.f32.mrb[6].mxu1  ;;  %v349_v44 = vadd.f32 %v523_v42, %v474_v17  ;;  %v343_v46 = vpop.f32.mrb[7].mxu0 }
  0xf3   : > { %v389_v45 = vadd.f32 %v535_v43, %v474_v17  ;;  %v383_v47 = vpop.f32.mrb[7].mxu1  ;;  %v344_v48 = vadd.f32 %v474_v17, %v343_v46 }
  0xf4   : > { %v384_v49 = vadd.f32 %v474_v17, %v383_v47  ;;  %400 = vst.msk [vmem:[%s617_s25 + $0x38] sm:$0xff] %vm392_vm1, %v349_v44 }
  0xf5   : > { %408 = vst.msk [vmem:[%s617_s25 + $0x78] sm:$0xff] %vm392_vm1, %v389_v45  ;;  %399 = vst.msk [vmem:[%s617_s25 + $0x30] sm:$0xff] %vm392_vm1, %v344_v48 }
  0xf6   : > { %407 = vst.msk [vmem:[%s617_s25 + $0x70] sm:$0xff] %vm392_vm1, %v384_v49 }
  0xf7 PF: > { %s13_s12 = sadd.s32 1, %s552_s12  }
  0xf8   : > { %p10_p4 = scmp.ge.s32.totalorder %s13_s12, 6  }
  0xfa   :  { %12 = sbr.rel (!%p10_p4) target bundleno = 1 (0x1), region = 62 }

// kernel: unet_up_forward.4
= control target key start
LH: loop header
LB: loop body
LE: loop exit
PB: predicated region body
PF: predicated region fallthrough
CT: control target
= control target key end

     0   :  { %vm38_vm0 = vcmask 64512   ;;  %vm232_vm1 = vcmask 261120   ;;  %s469_s1 = inlined_call_operand.vmem [shape: f32[8,32], index: 1, kind: input, shape index: {}]   ;;  %s470_s0 = inlined_call_operand.vmem [shape: f32[128,8], index: 0, kind: input, shape index: {}]   ;;  %s471_s2 = inlined_call_operand.vmem [shape: f32[1,32], index: 2, kind: input, shape index: {}]   ;;  %s472_s3 = inlined_call_operand.vmem [shape: f32[128,32], index: 3, kind: output, shape index: {}]  }
   0x1   :  { %v30_v0 = vld [vmem:[%s469_s1] sm:$0xff]  ;;  %v15_v3 = vld [vmem:[%s470_s0 + $0x8] sm:$0xff]  ;;  %v16_v5 = vld [vmem:[%s470_s0 + $0x10] sm:$0xff] }
   0x2   :  { %v14_v1 = vld [vmem:[%s470_s0] sm:$0xff]  ;;  %287 = vmatprep.subr.mxu0 %v30_v0  ;;  %313 = vmatprep.subr.mxu1 %v30_v0  ;;  %v23_v4 = vld [vmem:[%s470_s0 + $0x48] sm:$0xff]  ;;  %v24_v6 = vld [vmem:[%s470_s0 + $0x50] sm:$0xff] }
   0x3   :  { %v22_v2 = vld [vmem:[%s470_s0 + $0x40] sm:$0xff]  ;;  %288 = vmatpush3.msra.mxu0 %v30_v0  ;;  %314 = vmatpush3.msra.mxu1 %v30_v0  ;;  %v17_v7 = vld [vmem:[%s470_s0 + $0x18] sm:$0xff]  ;;  %v19_v11 = vld [vmem:[%s470_s0 + $0x28] sm:$0xff] }
   0x4   :  { %289 = vmatprep.mubr.msk.f32.mxu0 %vm38_vm0, %v14_v1  ;;  %301 = vmatprep.mubr.msk.f32.mxu1 %vm38_vm0, %v22_v2  ;;  %v25_v8 = vld [vmem:[%s470_s0 + $0x58] sm:$0xff]  ;;  %v18_v9 = vld [vmem:[%s470_s0 + $0x20] sm:$0xff]  ;;  %v27_v12 = vld [vmem:[%s470_s0 + $0x68] sm:$0xff] }
   0x5   :  { %290 = vmatmul.mubr.msk.f32.vlgmr.msra.gmra.mrb[0].mxu0 %vm38_vm0, %v15_v3  ;;  %302 = vmatmul.mubr.msk.f32.vlgmr.msra.gmra.mrb[0].mxu1 %vm38_vm0, %v23_v4  ;;  %v26_v10 = vld [vmem:[%s470_s0 + $0x60] sm:$0xff]  ;;  %v20_v13 = vld [vmem:[%s470_s0 + $0x30] sm:$0xff]  ;;  %v21_v15 = vld [vmem:[%s470_s0 + $0x38] sm:$0xff] }
   0x6   :  { %292 = vmatprep.mubr.msk.f32.mxu0 %vm38_vm0, %v16_v5  ;;  %304 = vmatprep.mubr.msk.f32.mxu1 %vm38_vm0, %v24_v6  ;;  %v28_v14 = vld [vmem:[%s470_s0 + $0x70] sm:$0xff]  ;;  %v29_v16 = vld [vmem:[%s470_s0 + $0x78] sm:$0xff]  ;;  %v253_v17 = vld [vmem:[%s471_s2] ss:$0 sm:$0xff] }
   0x9   :  { %293 = vmatmul.mubr.msk.f32.gmra.mrb[2].mxu0 %vm38_vm0, %v17_v7  ;;  %305 = vmatmul.mubr.msk.f32.gmra.mrb[2].mxu1 %vm38_vm0, %v25_v8 }
   0xa   :  { %295 = vmatprep.mubr.msk.f32.mxu0 %vm38_vm0, %v18_v9  ;;  %307 = vmatprep.mubr.msk.f32.mxu1 %vm38_vm0, %v26_v10 }
   0xd   :  { %296 = vmatmul.mubr.msk.f32.gmra.mrb[4].mxu0 %vm38_vm0, %v19_v11  ;;  %308 = vmatmul.mubr.msk.f32.gmra.mrb[4].mxu1 %vm38_vm0, %v27_v12 }
   0xe   :  { %298 = vmatprep.mubr.msk.f32.mxu0 %vm38_vm0, %v20_v13  ;;  %310 = vmatprep.mubr.msk.f32.mxu1 %vm38_vm0, %v28_v14 }
  0x11   :  { %299 = vmatmul.mubr.msk.f32.gmra.mrb[6].mxu0 %vm38_vm0, %v21_v15  ;;  %311 = vmatmul.mubr.msk.f32.gmra.mrb[6].mxu1 %vm38_vm0, %v29_v16 }
  0xd8   :  { %v291_v18 = vpop.f32.mrb[0].mxu0  ;;  %v303_v19 = vpop.f32.mrb[0].mxu1 }
  0xd9   :  { %v159_v20 = vadd.f32 %v291_v18, %v253_v17  ;;  %v199_v21 = vadd.f32 %v303_v19, %v253_v17  ;;  %v153_v22 = vpop.f32.mrb[1].mxu0  ;;  %v193_v23 = vpop.f32.mrb[1].mxu1 }
  0xda   :  { %v154_v24 = vadd.f32 %v253_v17, %v153_v22  ;;  %v194_v25 = vadd.f32 %v253_v17, %v193_v23 }
  0xdb   :  { %234 = vst.msk [vmem:[%s472_s3 + $0x8] sm:$0xff] %vm232_vm1, %v159_v20  ;;  %242 = vst.msk [vmem:[%s472_s3 + $0x48] sm:$0xff] %vm232_vm1, %v199_v21 }
  0xdc   :  { %233 = vst.msk [vmem:[%s472_s3] sm:$0xff] %vm232_vm1, %v154_v24  ;;  %241 = vst.msk [vmem:[%s472_s3 + $0x40] sm:$0xff] %vm232_vm1, %v194_v25  ;;  %v294_v26 = vpop.f32.mrb[2].mxu0  ;;  %v306_v27 = vpop.f32.mrb[2].mxu1 }
  0xdd   :  { %v169_v28 = vadd.f32 %v294_v26, %v253_v17  ;;  %v209_v29 = vadd.f32 %v306_v27, %v253_v17  ;;  %v163_v30 = vpop.f32.mrb[3].mxu0  ;;  %v203_v31 = vpop.f32.mrb[3].mxu1 }
  0xde   :  { %v164_v32 = vadd.f32 %v253_v17, %v163_v30  ;;  %v204_v33 = vadd.f32 %v253_v17, %v203_v31 }
  0xdf   :  { %236 = vst.msk [vmem:[%s472_s3 + $0x18] sm:$0xff] %vm232_vm1, %v169_v28  ;;  %244 = vst.msk [vmem:[%s472_s3 + $0x58] sm:$0xff] %vm232_vm1, %v209_v29 }
  0xe0   :  { %235 = vst.msk [vmem:[%s472_s3 + $0x10] sm:$0xff] %vm232_vm1, %v164_v32  ;;  %243 = vst.msk [vmem:[%s472_s3 + $0x50] sm:$0xff] %vm232_vm1, %v204_v33  ;;  %v297_v34 = vpop.f32.mrb[4].mxu0  ;;  %v309_v35 = vpop.f32.mrb[4].mxu1 }
  0xe1   :  { %v179_v36 = vadd.f32 %v297_v34, %v253_v17  ;;  %v219_v37 = vadd.f32 %v309_v35, %v253_v17  ;;  %v173_v38 = vpop.f32.mrb[5].mxu0  ;;  %v213_v39 = vpop.f32.mrb[5].mxu1 }
  0xe2   :  { %v174_v40 = vadd.f32 %v253_v17, %v173_v38  ;;  %v214_v41 = vadd.f32 %v253_v17, %v213_v39 }
  0xe3   :  { %238 = vst.msk [vmem:[%s472_s3 + $0x28] sm:$0xff] %vm232_vm1, %v179_v36  ;;  %246 = vst.msk [vmem:[%s472_s3 + $0x68] sm:$0xff] %vm232_vm1, %v219_v37 }
  0xe4   :  { %237 = vst.msk [vmem:[%s472_s3 + $0x20] sm:$0xff] %vm232_vm1, %v174_v40  ;;  %245 = vst.msk [vmem:[%s472_s3 + $0x60] sm:$0xff] %vm232_vm1, %v214_v41  ;;  %v300_v42 = vpop.f32.mrb[6].mxu0  ;;  %v312_v43 = vpop.f32.mrb[6].mxu1 }
  0xe5   :  { %v189_v44 = vadd.f32 %v300_v42, %v253_v17  ;;  %v229_v45 = vadd.f32 %v312_v43, %v253_v17  ;;  %v183_v46 = vpop.f32.mrb[7].mxu0  ;;  %v223_v47 = vpop.f32.mrb[7].mxu1 }
  0xe6   :  { %v184_v48 = vadd.f32 %v253_v17, %v183_v46  ;;  %v224_v49 = vadd.f32 %v253_v17, %v223_v47 }
  0xe7   :  { %240 = vst.msk [vmem:[%s472_s3 + $0x38] sm:$0xff] %vm232_vm1, %v189_v44  ;;  %248 = vst.msk [vmem:[%s472_s3 + $0x78] sm:$0xff] %vm232_vm1, %v229_v45 }
  0xe8   :  { %239 = vst.msk [vmem:[%s472_s3 + $0x30] sm:$0xff] %vm232_vm1, %v184_v48  ;;  %247 = vst.msk [vmem:[%s472_s3 + $0x70] sm:$0xff] %vm232_vm1, %v224_v49 }

// kernel: unet_up_forward.7
= control target key start
LH: loop header
LB: loop body
LE: loop exit
PB: predicated region body
PF: predicated region fallthrough
CT: control target
= control target key end

     0   :  { %s679_s12 = smov 0   ;;  %s681_s13 = smov 0   ;;  %s842_s0 = inlined_call_operand.vmem [shape: bf16[2,16,16,128], index: 0, kind: input, shape index: {}]   ;;  %s843_s1 = inlined_call_operand.vmem [shape: f32[1,1,128], index: 1, kind: input, shape index: {}]   ;;  %s844_s2 = inlined_call_operand.vmem [shape: f32[1,1,128], index: 2, kind: input, shape index: {}]   ;;  %s845_s3 = inlined_call_operand.vmem [shape: f32[2,16,16,128], index: 3, kind: output, shape index: {}]  }
   0x1   :  { %s683_s14 = smov 0  }
   0x2 LB: > { %s25_s15 = sadd.s32 1, %s653_s13  ;;  %p521_p0 = scmp.ge.s32.totalorder %s657_s14, 1  ;;  %s657_s14 = sphi %s683_s14, %s13_s14   ;;  %s653_s13 = sphi %s681_s13, %s847_s13   ;;  %s649_s12 = sphi %s679_s12, %s846_s12  }
   0x3   : > { %p27_p1 = scmp.ge.s32.totalorder %s25_s15, 2  ;;  %p159_p2 = scmp.lt.s32.totalorder %s657_s14, 3 }
   0x5   : > { %s849_s15 = smov (%p27_p1, %s25_s15), 0  ;;  %p160_p3 = pnand %p521_p0, %p159_p2 }
   0x6   : > { %p194_p4 = scmp.lt.s32.totalorder (!%p160_p3), %s649_s12, 1  ;;  %v708_v0 = vld [vmem:[%s843_s1] ss:$0 sm:$0xff] (!%p160_p3) }
   0x7   : > { %163 = sbr.rel (%p160_p3) target bundleno = 54 (0x36), region = 32  ;;  %v717_v9 = vld [vmem:[%s844_s2] ss:$0 sm:$0xff] (!%p160_p3) }
   0xe   : > { %s851_s12 = smov (!%p194_p4, %s649_s12), 1 }
   0xf   : > { %s530_s16 = sshll.u32 %s851_s12, 7  ;;  %s531_s24 = sshll.u32 %s851_s12, 8 }
  0x10   : > { %s703_s19 = scalar_lea.vmem %s842_s0, %s530_s16  ;;  %s735_s27 = scalar_lea.vmem %s845_s3, %s531_s24 }
  0x11   : > { %v533_v1 = vld [vmem:[%s703_s19] sm:$0xff]   ;;  %v596_v2 = vld [vmem:[%s703_s19 + $0x8] sm:$0xff]   ;;  %v597_v3 = vld [vmem:[%s703_s19 + $0x10] sm:$0xff]  }
  0x12   : > { %v534_v4 = vunpack.c.l.bf16 %v533_v1  ;;  %v535_v5 = vunpack.c.h.bf16 %v533_v1  ;;  %v538_v6 = vunpack.c.l.bf16 %v596_v2  ;;  %v539_v7 = vunpack.c.h.bf16 %v596_v2  ;;  %v598_v8 = vld [vmem:[%s703_s19 + $0x18] sm:$0xff]   ;;  %v599_v30 = vld [vmem:[%s703_s19 + $0x20] sm:$0xff]   ;;  %v600_v31 = vld [vmem:[%s703_s19 + $0x28] sm:$0xff]  }
  0x13   : > { %v542_v10 = vunpack.c.l.bf16 %v597_v3  ;;  %v543_v11 = vunpack.c.h.bf16 %v597_v3  ;;  %v546_v12 = vunpack.c.l.bf16 %v598_v8  ;;  %v547_v13 = vunpack.c.h.bf16 %v598_v8  ;;  %v601_v36 = vld [vmem:[%s703_s19 + $0x30] sm:$0xff]   ;;  %v602_v37 = vld [vmem:[%s703_s19 + $0x38] sm:$0xff]   ;;  %v603_v3 = vld [vmem:[%s703_s19 + $0x40] sm:$0xff]  }
  0x14   : > { %v286_v14 = vmul.f32 %v534_v4, %v708_v0  ;;  %v287_v15 = vmul.f32 %v535_v5, %v708_v0  ;;  %v288_v16 = vmul.f32 %v538_v6, %v708_v0  ;;  %v289_v17 = vmul.f32 %v539_v7, %v708_v0  ;;  %v604_v4 = vld [vmem:[%s703_s19 + $0x48] sm:$0xff]  }
  0x15   : > { %v290_v18 = vmul.f32 %v542_v10, %v708_v0  ;;  %v291_v19 = vmul.f32 %v543_v11, %v708_v0  ;;  %v292_v20 = vmul.f32 %v546_v12, %v708_v0  ;;  %v293_v21 = vmul.f32 %v547_v13, %v708_v0  ;;  %v605_v10 = vld [vmem:[%s703_s19 + $0x50] sm:$0xff]   ;;  %v606_v11 = vld [vmem:[%s703_s19 + $0x58] sm:$0xff]  }
  0x16   : > { %v325_v22 = vadd.f32 %v717_v9, %v286_v14  ;;  %v326_v23 = vadd.f32 %v717_v9, %v287_v15  ;;  %v327_v24 = vadd.f32 %v717_v9, %v288_v16  ;;  %v328_v25 = vadd.f32 %v717_v9, %v289_v17 }
  0x17   : > { %v329_v26 = vadd.f32 %v717_v9, %v290_v18  ;;  %v330_v27 = vadd.f32 %v717_v9, %v291_v19  ;;  %v331_v28 = vadd.f32 %v717_v9, %v292_v20  ;;  %v332_v29 = vadd.f32 %v717_v9, %v293_v21 }
  0x18   : > { %v357_v32 = vmax.f32 %v325_v22, 0.0  ;;  %v358_v33 = vmax.f32 %v326_v23, 0.0  ;;  %v359_v34 = vmax.f32 %v327_v24, 0.0  ;;  %v360_v35 = vmax.f32 %v328_v25, 0.0 }
  0x19   : > { %v361_v38 = vmax.f32 %v329_v26, 0.0  ;;  %v362_v39 = vmax.f32 %v330_v27, 0.0  ;;  %v363_v40 = vmax.f32 %v331_v28, 0.0  ;;  %v364_v41 = vmax.f32 %v332_v29, 0.0 }
  0x1a   : > { %389 = vst [vmem:[%s735_s27] sm:$0xff] %v357_v32  ;;  %390 = vst [vmem:[%s735_s27 + $0x8] sm:$0xff] %v358_v33  ;;  %v550_v42 = vunpack.c.l.bf16 %v599_v30  ;;  %v551_v43 = vunpack.c.h.bf16 %v599_v30  ;;  %v554_v44 = vunpack.c.l.bf16 %v600_v31  ;;  %v555_v45 = vunpack.c.h.bf16 %v600_v31 }
  0x1b   : > { %391 = vst [vmem:[%s735_s27 + $0x10] sm:$0xff] %v359_v34  ;;  %392 = vst [vmem:[%s735_s27 + $0x18] sm:$0xff] %v360_v35  ;;  %v558_v46 = vunpack.c.l.bf16 %v601_v36  ;;  %v559_v47 = vunpack.c.h.bf16 %v601_v36  ;;  %v562_v48 = vunpack.c.l.bf16 %v602_v37  ;;  %v563_v49 = vunpack.c.h.bf16 %v602_v37 }
  0x1c   : > { %393 = vst [vmem:[%s735_s27 + $0x20] sm:$0xff] %v361_v38  ;;  %394 = vst [vmem:[%s735_s27 + $0x28] sm:$0xff] %v362_v39  ;;  %v294_v50 = vmul.f32 %v550_v42, %v708_v0  ;;  %v295_v51 = vmul.f32 %v551_v43, %v708_v0  ;;  %v296_v52 = vmul.f32 %v554_v44, %v708_v0  ;;  %v566_v16 = vunpack.c.l.bf16 %v603_v3 }
  0x1d   : > { %395 = vst [vmem:[%s735_s27 + $0x30] sm:$0xff] %v363_v40  ;;  %396 = vst [vmem:[%s735_s27 + $0x38] sm:$0xff] %v364_v41  ;;  %v297_v53 = vmul.f32 %v555_v45, %v708_v0  ;;  %v298_v54 = vmul.f32 %v558_v46, %v708_v0  ;;  %v299_v55 = vmul.f32 %v559_v47, %v708_v0  ;;  %v567_v17 = vunpack.c.h.bf16 %v603_v3  ;;  %v607_v40 = vld [vmem:[%s703_s19 + $0x60] sm:$0xff]   ;;  %v608_v41 = vld [vmem:[%s703_s19 + $0x68] sm:$0xff]  }
  0x1e   : > { %v300_v56 = vmul.f32 %v562_v48, %v708_v0  ;;  %v301_v57 = vmul.f32 %v563_v49, %v708_v0  ;;  %v333_v58 = vadd.f32 %v717_v9, %v294_v50  ;;  %v334_v59 = vadd.f32 %v717_v9, %v295_v51  ;;  %v609_v46 = vld [vmem:[%s703_s19 + $0x70] sm:$0xff]   ;;  %v610_v47 = vld [vmem:[%s703_s19 + $0x78] sm:$0xff]  }
  0x1f   : > { %v335_v60 = vadd.f32 %v717_v9, %v296_v52  ;;  %v336_v61 = vadd.f32 %v717_v9, %v297_v53  ;;  %v337_v62 = vadd.f32 %v717_v9, %v298_v54  ;;  %v338_v63 = vadd.f32 %v717_v9, %v299_v55 }
  0x20   : > { %v339_v1 = vadd.f32 %v717_v9, %v300_v56  ;;  %v340_v2 = vadd.f32 %v717_v9, %v301_v57  ;;  %v365_v5 = vmax.f32 %v333_v58, 0.0  ;;  %v366_v6 = vmax.f32 %v334_v59, 0.0 }
  0x21   : > { %v367_v7 = vmax.f32 %v335_v60, 0.0  ;;  %v368_v8 = vmax.f32 %v336_v61, 0.0  ;;  %v369_v12 = vmax.f32 %v337_v62, 0.0  ;;  %v370_v13 = vmax.f32 %v338_v63, 0.0 }
  0x22   : > { %v371_v14 = vmax.f32 %v339_v1, 0.0  ;;  %v372_v15 = vmax.f32 %v340_v2, 0.0  ;;  %397 = vst [vmem:[%s735_s27 + $0x40] sm:$0xff] %v365_v5  ;;  %398 = vst [vmem:[%s735_s27 + $0x48] sm:$0xff] %v366_v6  ;;  %v570_v18 = vunpack.c.l.bf16 %v604_v4  ;;  %v571_v19 = vunpack.c.h.bf16 %v604_v4 }
  0x23   : > { %399 = vst [vmem:[%s735_s27 + $0x50] sm:$0xff] %v367_v7  ;;  %400 = vst [vmem:[%s735_s27 + $0x58] sm:$0xff] %v368_v8  ;;  %v574_v20 = vunpack.c.l.bf16 %v605_v10  ;;  %v575_v21 = vunpack.c.h.bf16 %v605_v10  ;;  %v578_v22 = vunpack.c.l.bf16 %v606_v11  ;;  %v579_v23 = vunpack.c.h.bf16 %v606_v11 }
  0x24   : > { %401 = vst [vmem:[%s735_s27 + $0x60] sm:$0xff] %v369_v12  ;;  %402 = vst [vmem:[%s735_s27 + $0x68] sm:$0xff] %v370_v13  ;;  %v302_v24 = vmul.f32 %v566_v16, %v708_v0  ;;  %v303_v25 = vmul.f32 %v567_v17, %v708_v0  ;;  %v304_v26 = vmul.f32 %v570_v18, %v708_v0  ;;  %v582_v52 = vunpack.c.l.bf16 %v607_v40 }
  0x25   : > { %403 = vst [vmem:[%s735_s27 + $0x70] sm:$0xff] %v371_v14  ;;  %404 = vst [vmem:[%s735_s27 + $0x78] sm:$0xff] %v372_v15  ;;  %v305_v27 = vmul.f32 %v571_v19, %v708_v0  ;;  %v306_v28 = vmul.f32 %v574_v20, %v708_v0  ;;  %v307_v29 = vmul.f32 %v575_v21, %v708_v0  ;;  %v583_v53 = vunpack.c.h.bf16 %v607_v40 }
  0x26   : > { %v308_v30 = vmul.f32 %v578_v22, %v708_v0  ;;  %v309_v31 = vmul.f32 %v579_v23, %v708_v0  ;;  %v341_v32 = vadd.f32 %v717_v9, %v302_v24  ;;  %v342_v33 = vadd.f32 %v717_v9, %v303_v25 }
  0x27   : > { %v343_v34 = vadd.f32 %v717_v9, %v304_v26  ;;  %v344_v35 = vadd.f32 %v717_v9, %v305_v27  ;;  %v345_v36 = vadd.f32 %v717_v9, %v306_v28  ;;  %v346_v37 = vadd.f32 %v717_v9, %v307_v29 }
  0x28   : > { %v347_v38 = vadd.f32 %v717_v9, %v308_v30  ;;  %v348_v39 = vadd.f32 %v717_v9, %v309_v31  ;;  %v373_v42 = vmax.f32 %v341_v32, 0.0  ;;  %v374_v43 = vmax.f32 %v342_v33, 0.0 }
  0x29   : > { %v375_v44 = vmax.f32 %v343_v34, 0.0  ;;  %v376_v45 = vmax.f32 %v344_v35, 0.0  ;;  %v377_v48 = vmax.f32 %v345_v36, 0.0  ;;  %v378_v49 = vmax.f32 %v346_v37, 0.0 }
  0x2a   : > { %v379_v50 = vmax.f32 %v347_v38, 0.0  ;;  %v380_v51 = vmax.f32 %v348_v39, 0.0  ;;  %405 = vst [vmem:[%s735_s27 + $0x80] sm:$0xff] %v373_v42  ;;  %406 = vst [vmem:[%s735_s27 + $0x88] sm:$0xff] %v374_v43  ;;  %v586_v54 = vunpack.c.l.bf16 %v608_v41  ;;  %v587_v55 = vunpack.c.h.bf16 %v608_v41 }
  0x2b   : > { %407 = vst [vmem:[%s735_s27 + $0x90] sm:$0xff] %v375_v44  ;;  %408 = vst [vmem:[%s735_s27 + $0x98] sm:$0xff] %v376_v45  ;;  %v590_v56 = vunpack.c.l.bf16 %v609_v46  ;;  %v591_v57 = vunpack.c.h.bf16 %v609_v46  ;;  %v594_v58 = vunpack.c.l.bf16 %v610_v47  ;;  %v595_v59 = vunpack.c.h.bf16 %v610_v47 }
  0x2c   : > { %409 = vst [vmem:[%s735_s27 + $0xa0] sm:$0xff] %v377_v48  ;;  %410 = vst [vmem:[%s735_s27 + $0xa8] sm:$0xff] %v378_v49  ;;  %v310_v60 = vmul.f32 %v582_v52, %v708_v0  ;;  %v311_v61 = vmul.f32 %v583_v53, %v708_v0  ;;  %v312_v62 = vmul.f32 %v586_v54, %v708_v0 }
  0x2d   : > { %411 = vst [vmem:[%s735_s27 + $0xb0] sm:$0xff] %v379_v50  ;;  %412 = vst [vmem:[%s735_s27 + $0xb8] sm:$0xff] %v380_v51  ;;  %v313_v63 = vmul.f32 %v587_v55, %v708_v0  ;;  %v314_v1 = vmul.f32 %v590_v56, %v708_v0  ;;  %v315_v2 = vmul.f32 %v591_v57, %v708_v0 }
  0x2e   : > { %v316_v3 = vmul.f32 %v594_v58, %v708_v0  ;;  %v317_v4 = vmul.f32 %v595_v59, %v708_v0  ;;  %v349_v5 = vadd.f32 %v717_v9, %v310_v60  ;;  %v350_v6 = vadd.f32 %v717_v9, %v311_v61 }
  0x2f   : > { %v351_v7 = vadd.f32 %v717_v9, %v312_v62  ;;  %v352_v8 = vadd.f32 %v717_v9, %v313_v63  ;;  %v353_v10 = vadd.f32 %v717_v9, %v314_v1  ;;  %v354_v11 = vadd.f32 %v717_v9, %v315_v2 }
  0x30   : > { %v355_v0 = vadd.f32 %v717_v9, %v316_v3  ;;  %v356_v12 = vadd.f32 %v717_v9, %v317_v4  ;;  %v381_v13 = vmax.f32 %v349_v5, 0.0  ;;  %v382_v14 = vmax.f32 %v350_v6, 0.0 }
  0x31   : > { %v383_v15 = vmax.f32 %v351_v7, 0.0  ;;  %v384_v16 = vmax.f32 %v352_v8, 0.0  ;;  %v385_v17 = vmax.f32 %v353_v10, 0.0  ;;  %v386_v18 = vmax.f32 %v354_v11, 0.0 }
  0x32   : > { %v387_v19 = vmax.f32 %v355_v0, 0.0  ;;  %v388_v20 = vmax.f32 %v356_v12, 0.0  ;;  %413 = vst [vmem:[%s735_s27 + $0xc0] sm:$0xff] %v381_v13  ;;  %414 = vst [vmem:[%s735_s27 + $0xc8] sm:$0xff] %v382_v14 }
  0x33   : > { %415 = vst [vmem:[%s735_s27 + $0xd0] sm:$0xff] %v383_v15  ;;  %416 = vst [vmem:[%s735_s27 + $0xd8] sm:$0xff] %v384_v16 }
  0x34   : > { %417 = vst [vmem:[%s735_s27 + $0xe0] sm:$0xff] %v385_v17  ;;  %418 = vst [vmem:[%s735_s27 + $0xe8] sm:$0xff] %v386_v18 }
  0x35   : > { %419 = vst [vmem:[%s735_s27 + $0xf0] sm:$0xff] %v387_v19  ;;  %420 = vst [vmem:[%s735_s27 + $0xf8] sm:$0xff] %v388_v20 }
  0x36 PF: > { %s13_s14 = sadd.s32 1, %s657_s14   ;;  %s846_s12 = smov %s653_s13 }
  0x37   : > { %p10_p5 = scmp.ge.s32.totalorder %s13_s14, 4   ;;  %s847_s13 = smov %s849_s15 }
  0x39   :  { %12 = sbr.rel (!%p10_p5) target bundleno = 2 (0x2), region = 62 }

// kernel: unet_up_forward.6
= control target key start
LH: loop header
LB: loop body
LE: loop exit
PB: predicated region body
PF: predicated region fallthrough
CT: control target
= control target key end

     0   :  { %s4706_s15 = smov 0   ;;  %s4708_s16 = smov 0   ;;  %s5770_s0 = inlined_call_operand.vmem [shape: bf16[2,1,18,18,14], index: 0, kind: input, shape index: {}]   ;;  %s5771_s1 = inlined_call_operand.vmem [shape: bf16[9,14,128], index: 1, kind: input, shape index: {}]   ;;  %s5772_s2 = inlined_call_operand.vmem [shape: f32[1,128], index: 2, kind: input, shape index: {}]   ;;  %s5773_s3 = inlined_call_operand.vmem [shape: bf16[2,16,16,128], index: 3, kind: output, shape index: {0}]   ;;  %s5774_s4 = inlined_call_operand.vmem [shape: f32[2,2,128], index: 4, kind: output, shape index: {1}]  }
   0x1   :  { %s4710_s17 = smov 0  }
   0x2 LB: > { %s27_s18 = sadd.s32 1, %s4675_s16  ;;  %p3465_p0 = scmp.ge.s32.totalorder %s4679_s17, 1  ;;  %s4679_s17 = sphi %s4710_s17, %s15_s17   ;;  %s4675_s16 = sphi %s4708_s16, %s5850_s16   ;;  %s4671_s15 = sphi %s4706_s15, %s5849_s15  }
   0x3   : > { %p29_p1 = scmp.ge.s32.totalorder %s27_s18, 2  ;;  %p187_p2 = scmp.lt.s32.totalorder %s4679_s17, 3 }
   0x5   : > { %s5852_s18 = smov (%p29_p1, %s27_s18), 0  ;;  %p188_p3 = pnand %p3465_p0, %p187_p2 }
   0x7   : > { %191 = sbr.rel (%p188_p3) target bundleno = 573 (0x23d), region = 32 }
   0xe   : > { %v4626_v0 = vld [vmem:[%s5771_s1 + $0x8] sm:$0x7f]   ;;  %vm802_vm0 = vcmask 1046528   ;;  %p227_p4 = scmp.lt.s32.totalorder %s4671_s15, 1  ;;  %v4627_v1 = vld [vmem:[%s5771_s1 + $0x20] sm:$0x7f]  }
   0xf   : > { %4591 = vmatprep.subr.msk.bf16.mxu1 %vm802_vm0, %v4626_v0  ;;  %v804_v2 = vsel %vm802_vm0, %v4626_v0, 0  ;;  %4595 = vmatprep.subr.msk.bf16.mxu0 %vm802_vm0, %v4627_v1  ;;  %v4736_v3 = vsel %vm802_vm0, %v4627_v1, 0  ;;  %v4628_v4 = vld [vmem:[%s5771_s1] sm:$0x7f]   ;;  %vm310_vm1 = vsmask.f32 3328 }
  0x10   : > { %4028 = vmatpush3.bf16.msra.mxu1 %v804_v2  ;;  %s5854_s15 = smov (!%p227_p4, %s4671_s15), 1  ;;  %5805 = vst [vmem:[#allocation2_spill] sm:$0xff] %v4736_v3  ;;  %4164 = vmatpush3.bf16.msra.mxu0 %v4736_v3  ;;  %v4747_v5 = vld [vmem:[%s5771_s1 + $0x28] sm:$0x7f]   ;;  %vm311_vm2 = vsmask.f32 7440 }
  0x11   : > { %s4601_s25 = smul.u32 216, %s5854_s15  ;;  %4592 = vmatprep.subr.msk.bf16.mxu1 %vm802_vm0, %v4628_v4  ;;  %4597 = vmatprep.subr.msk.bf16.mxu0 %vm802_vm0, %v4747_v5  ;;  %vm753_vm3 = vcmask 113664   ;;  %v4777_v17 = vsel %vm802_vm0, %v4628_v4, 0  ;;  %vm4789_vm4 = vmor %vm310_vm1, %vm311_vm2  ;;  %vm1280_vm5 = vcmask 1042432   ;;  %vm1281_vm6 = vcmask 1046532   ;;  %s3746_s23 = sshll.u32 %s5854_s15, 7 }
  0x12   : > { %vm4978_vm7 = vmor %vm1280_vm5, %vm1281_vm6  ;;  %s5703_s26 = scalar_lea.vmem %s5773_s3, %s3746_s23  ;;  %s3469_s27 = sshll.u32 %s5854_s15, 1  ;;  %vm3328_vm8 = vcmask 1040384  }
  0x13   : > { %s4752_s30 = scalar_lea.vmem %s5770_s0, %s4601_s25 }
  0x14   : > { %v4755_v6 = vld [vmem:[%s4752_s30] sm:$0xf]  ;;  %v4758_v7 = vld [vmem:[%s4752_s30 + $0x4] sm:$0xf]  ;;  %v256_v8 = vld [vmem:[%s4752_s30 + $0x8] sm:$0x1] }
  0x15   : > { %v314_v9 = vshrl.u32 %v4755_v6, 16  ;;  %v317_v10 = vshll.u32 %v4755_v6, 16  ;;  %v323_v11 = vshll.u32 %v4758_v7, 16  ;;  %v327_v12 = vshrl.u32 %v4758_v7, 16  ;;  %v4768_v13 = vld [vmem:[%s4752_s30 + $0xc] sm:$0xf] }
  0x16   : > { %v333_v14 = vshll.u32 %v256_v8, 16  ;;  %v4771_v15 = vld [vmem:[%s4752_s30 + $0x10] sm:$0xf]  ;;  %v4774_v16 = vld [vmem:[%s4752_s30 + $0x14] sm:$0x1]  ;;  %v338_v23 = vshrl.u32 %v4768_v13, 16 }
  0x17   : > { %v316_v18 = vrot.slane %v314_v9, 4  ;;  %v319_v19 = vrot.slane %v317_v10, 5  ;;  %v325_v20 = vrot.slane %v323_v11, 5  ;;  %v329_v21 = vrot.slane %v327_v12, 4  ;;  %v4785_v30 = vld [vmem:[%s4752_s30 + $0x18] sm:$0xf] }
  0x18   : > { %v335_v22 = vrot.slane %v333_v14, 5  ;;  %v341_v24 = vshll.u32 %v4768_v13, 16  ;;  %v347_v25 = vshll.u32 %v4771_v15, 16  ;;  %v351_v28 = vshrl.u32 %v4771_v15, 16  ;;  %v4798_v36 = vld [vmem:[%s4752_s30 + $0x1c] sm:$0xf] }
  0x19   : > { %v320_v26 = vor.u32 %v319_v19, %v316_v18  ;;  %v330_v27 = vor.u32 %v329_v21, %v325_v20  ;;  %v357_v29 = vshll.u32 %v4774_v16, 16  ;;  %v340_v32 = vrot.slane %v338_v23, 4  ;;  %v4802_v43 = vld [vmem:[%s4752_s30 + $0x20] sm:$0x1]  ;;  %v4814_v58 = vld [vmem:[%s4752_s30 + $0x24] sm:$0xf] }
  0x1a   : > { %v343_v33 = vrot.slane %v341_v24, 5  ;;  %v349_v34 = vrot.slane %v347_v25, 5  ;;  %v4795_v35 = vcombine.low %v4768_v13, %v4771_v15  ;;  %v353_v39 = vrot.slane %v351_v28, 4  ;;  %v4822_v63 = vld [vmem:[%s4752_s30 + $0x28] sm:$0xf] }
  0x1b   : > { %v321_v37 = vrot.slane %v320_v26, 4  ;;  %v331_v38 = vrot.slane %v330_v27, 4  ;;  %v359_v40 = vrot.slane %v357_v29, 5  ;;  %v1295_v42 = vrot.slane %v4774_v16, 5  ;;  %v4825_v0 = vld [vmem:[%s4752_s30 + $0x2c] sm:$0x1] }
  0x1c   : > { %v344_v41 = vor.u32 %v343_v33, %v340_v32  ;;  %v362_v44 = vshrl.u32 %v4785_v30, 16  ;;  %v365_v45 = vshll.u32 %v4785_v30, 16  ;;  %v354_v48 = vor.u32 %v353_v39, %v349_v34  ;;  %v4832_v9 = vld [vmem:[%s4752_s30 + $0x30] sm:$0xf]  ;;  %v4847_v25 = vld [vmem:[%s4752_s30 + $0x38] sm:$0x1] }
  0x1d   : > { %v326_v46 = vsel %vm4789_vm4, %v321_v37, %v325_v20  ;;  %v336_v47 = vsel %vm4789_vm4, %v331_v38, %v335_v22  ;;  %v371_v49 = vshll.u32 %v4798_v36, 16  ;;  %v375_v56 = vshrl.u32 %v4798_v36, 16  ;;  %v4840_v22 = vld [vmem:[%s4752_s30 + $0x34] sm:$0xf]  ;;  %v4854_v39 = vld [vmem:[%s4752_s30 + $0x3c] sm:$0xf] }
  0x1e   : > { %v3472_v50 = vcombine.low %v326_v46, %v336_v47  ;;  %v345_v51 = vrot.slane %v344_v41, 4  ;;  %v364_v52 = vrot.slane %v362_v44, 4  ;;  %v367_v53 = vrot.slane %v365_v45, 5  ;;  %v4861_v45 = vld [vmem:[%s4752_s30 + $0x40] sm:$0xf] }
  0x1f   : > { %v355_v54 = vrot.slane %v354_v48, 4  ;;  %v373_v55 = vrot.slane %v371_v49, 5  ;;  %v381_v57 = vshll.u32 %v4802_v43, 16  ;;  %v1299_v61 = vrot.slane %v4798_v36, 5 }
  0x20   : > { %4029 = vmatprep.mubr.msk.bf16.mxu1 %vm753_vm3, %v3472_v50  ;;  %v350_v59 = vsel %vm4789_vm4, %v345_v51, %v349_v34  ;;  %v368_v60 = vor.u32 %v367_v53, %v364_v52  ;;  %v1302_v62 = vrot.slane %v4802_v43, 5  ;;  %v377_v2 = vrot.slane %v375_v56, 4  ;;  %v4868_v50 = vld [vmem:[%s5771_s1 + $0x30] sm:$0x7f]  }
  0x21   : > { %v360_v1 = vsel %vm4789_vm4, %v355_v54, %v359_v40  ;;  %v383_v4 = vrot.slane %v381_v57, 5  ;;  %v2164_v8 = vsel %vm802_vm0, %v4747_v5, 0  ;;  %v386_v12 = vshrl.u32 %v4814_v58, 16  ;;  %v4878_v57 = vld [vmem:[%s4752_s30 + $0x44] sm:$0x1] }
  0x22   : > { %v3473_v10 = vcombine.low %v350_v59, %v360_v1  ;;  %v369_v11 = vrot.slane %v368_v60, 4  ;;  %v389_v14 = vshll.u32 %v4814_v58, 16  ;;  %v378_v18 = vor.u32 %v377_v2, %v373_v55  ;;  %v4883_v1 = vld [vmem:[%s4752_s30 + $0x48] sm:$0xf] }
  0x23   : > { %v395_v19 = vshll.u32 %v4822_v63, 16  ;;  %v399_v20 = vshrl.u32 %v4822_v63, 16  ;;  %v405_v21 = vshll.u32 %v4825_v0, 16  ;;  %v388_v23 = vrot.slane %v386_v12, 4  ;;  %v4889_v12 = vld [vmem:[%s4752_s30 + $0x4c] sm:$0xf] }
  0x24   : > { %4165 = vmatprep.mubr.msk.bf16.mxu0 %vm753_vm3, %v3473_v10  ;;  %4030 = vmatmul.mubr.msk.bf16.vlgmr.msra.gmra.mrb[0].mxu1 %vm753_vm3, %v3473_v10  ;;  %v374_v5 = vsel %vm4789_vm4, %v369_v11, %v373_v55  ;;  %v391_v24 = vrot.slane %v389_v14, 5  ;;  %v410_v26 = vshrl.u32 %v4832_v9, 16  ;;  %v379_v27 = vrot.slane %v378_v18, 4 }
  0x25   : > { %4062 = vmatpush3.bf16.msra.mxu1 %v4777_v17  ;;  %v397_v28 = vrot.slane %v395_v19, 5  ;;  %v401_v29 = vrot.slane %v399_v20, 4  ;;  %v407_v32 = vrot.slane %v405_v21, 5  ;;  %v413_v37 = vshll.u32 %v4832_v9, 16 }
  0x26   : > { %v392_v33 = vor.u32 %v391_v24, %v388_v23  ;;  %v412_v34 = vrot.slane %v410_v26, 4  ;;  %v419_v38 = vshll.u32 %v4840_v22, 16  ;;  %v384_v40 = vsel %vm4789_vm4, %v379_v27, %v383_v4  ;;  %v4904_v27 = vld [vmem:[%s4752_s30 + $0x50] sm:$0x1] }
  0x27   : > { %v402_v41 = vor.u32 %v401_v29, %v397_v28  ;;  %v423_v44 = vshrl.u32 %v4840_v22, 16  ;;  %v429_v17 = vshll.u32 %v4847_v25, 16  ;;  %v4863_v46 = vcombine.low %v374_v5, %v384_v40  ;;  %v4914_v40 = vld [vmem:[%s4752_s30 + $0x58] sm:$0xf] }
  0x28   : > { %v393_v47 = vrot.slane %v392_v33, 4  ;;  %v415_v48 = vrot.slane %v413_v37, 5  ;;  %v421_v49 = vrot.slane %v419_v38, 5  ;;  %v434_v54 = vshrl.u32 %v4854_v39, 16 }
  0x29   : > { %5808 = vst [vmem:[#allocation3_spill] sm:$0xff] %v4863_v46  ;;  %v403_v51 = vrot.slane %v402_v41, 4  ;;  %v425_v52 = vrot.slane %v423_v44, 4  ;;  %v431_v53 = vrot.slane %v429_v17, 5  ;;  %4166 = vmatmul.mubr.msk.bf16.vlgmr.msra.gmra.mrb[0].mxu0 %vm753_vm3, %v4863_v46  ;;  %4033 = vmatprep.mubr.msk.bf16.mxu1 %vm753_vm3, %v4863_v46  ;;  %v437_v59 = vshll.u32 %v4854_v39, 16 }
  0x2a   : > { %v398_v55 = vsel %vm4789_vm4, %v393_v47, %v397_v28  ;;  %v416_v56 = vor.u32 %v415_v48, %v412_v34  ;;  %v443_v60 = vshll.u32 %v4861_v45, 16  ;;  %4198 = vmatpush3.bf16.msra.mxu0 %v2164_v8  ;;  %v436_v10 = vrot.slane %v434_v54, 4 }
  0x2b   : > { %v408_v2 = vsel %vm4789_vm4, %v403_v51, %v407_v32  ;;  %v426_v4 = vor.u32 %v425_v52, %v421_v49  ;;  %v447_v11 = vshrl.u32 %v4861_v45, 16  ;;  %v439_v19 = vrot.slane %v437_v59, 5  ;;  %4598 = vmatprep.subr.msk.bf16.mxu0 %vm802_vm0, %v4868_v50  ;;  %v4909_v32 = vld [vmem:[%s4752_s30 + $0x54] sm:$0xf] }
  0x2c   : > { %v4891_v14 = vcombine.low %v398_v55, %v408_v2  ;;  %v417_v18 = vrot.slane %v416_v56, 4  ;;  %v445_v20 = vrot.slane %v443_v60, 5  ;;  %v453_v5 = vshll.u32 %v4878_v57, 16  ;;  %v4928_v55 = vld [vmem:[%s4752_s30 + $0x5c] sm:$0x1] }
  0x2d   : > { %v427_v8 = vrot.slane %v426_v4, 4  ;;  %v449_v21 = vrot.slane %v447_v11, 4  ;;  %v458_v23 = vshrl.u32 %v4883_v1, 16  ;;  %v440_v26 = vor.u32 %v439_v19, %v436_v10  ;;  %v4933_v60 = vld [vmem:[%s4752_s30 + $0x60] sm:$0xf] }
  0x2e   : > { %5809 = vst [vmem:[#allocation4_spill] sm:$0xff] %v4891_v14  ;;  %4169 = vmatprep.mubr.msk.bf16.mxu0 %vm753_vm3, %v4891_v14  ;;  %4034 = vmatmul.mubr.msk.bf16.gmra.mrb[4].mxu1 %vm753_vm3, %v4891_v14  ;;  %v422_v24 = vsel %vm4789_vm4, %v417_v18, %v421_v49  ;;  %v461_v28 = vshll.u32 %v4883_v1, 16  ;;  %v467_v29 = vshll.u32 %v4889_v12, 16  ;;  %v455_v37 = vrot.slane %v453_v5, 5  ;;  %v4938_v18 = vld [vmem:[%s4752_s30 + $0x64] sm:$0xf] }
  0x2f   : > { %v432_v33 = vsel %vm4789_vm4, %v427_v8, %v431_v53  ;;  %v450_v34 = vor.u32 %v449_v21, %v445_v20  ;;  %v460_v38 = vrot.slane %v458_v23, 4  ;;  %v441_v44 = vrot.slane %v440_v26, 4 }
  0x30   : > { %v4916_v41 = vcombine.low %v422_v24, %v432_v33  ;;  %v463_v17 = vrot.slane %v461_v28, 5  ;;  %v469_v47 = vrot.slane %v467_v29, 5  ;;  %v471_v49 = vshrl.u32 %v4889_v12, 16  ;;  %v4952_v33 = vld [vmem:[%s4752_s30 + $0x68] sm:$0x1] }
  0x31   : > { %v451_v48 = vrot.slane %v450_v34, 4  ;;  %v477_v51 = vshll.u32 %v4904_v27, 16  ;;  %v482_v52 = vshrl.u32 %v4909_v32, 16  ;;  %v446_v53 = vsel %vm4789_vm4, %v441_v44, %v445_v20 }
  0x32   : > { %5810 = vst [vmem:[#allocation5_spill] sm:$0xff] %v4916_v41  ;;  %4170 = vmatmul.mubr.msk.bf16.gmra.mrb[4].mxu0 %vm753_vm3, %v4916_v41  ;;  %4037 = vmatprep.mubr.msk.bf16.mxu1 %vm753_vm3, %v4916_v41  ;;  %v464_v54 = vor.u32 %v463_v17, %v460_v38  ;;  %v485_v56 = vshll.u32 %v4909_v32, 16  ;;  %v491_v59 = vshll.u32 %v4914_v40, 16  ;;  %v473_v4 = vrot.slane %v471_v49, 4  ;;  %v4957_v38 = vld [vmem:[%s4752_s30 + $0x6c] sm:$0xf] }
  0x33   : > { %v456_v2 = vsel %vm4789_vm4, %v451_v48, %v455_v37  ;;  %v479_v10 = vrot.slane %v477_v51, 5  ;;  %v484_v11 = vrot.slane %v482_v52, 4  ;;  %v495_v23 = vshrl.u32 %v4914_v40, 16  ;;  %v5128_v41 = vld [vmem:[%s4752_s30 + $0x9c] sm:$0xf] }
  0x34   : > { %v4940_v19 = vcombine.low %v446_v53, %v456_v2  ;;  %v465_v20 = vrot.slane %v464_v54, 4  ;;  %v487_v8 = vrot.slane %v485_v56, 5  ;;  %v493_v21 = vrot.slane %v491_v59, 5 }
  0x35   : > { %v474_v5 = vor.u32 %v473_v4, %v469_v47  ;;  %v501_v24 = vshll.u32 %v4928_v55, 16  ;;  %v506_v26 = vshrl.u32 %v4933_v60, 16  ;;  %v509_v34 = vshll.u32 %v4933_v60, 16 }
  0x36   : > { %5811 = vst [vmem:[#allocation6_spill] sm:$0xff] %v4940_v19  ;;  %4173 = vmatprep.mubr.msk.bf16.mxu0 %vm753_vm3, %v4940_v19  ;;  %4038 = vmatmul.mubr.msk.bf16.gmra.mrb[8].mxu1 %vm753_vm3, %v4940_v19  ;;  %v470_v28 = vsel %vm4789_vm4, %v465_v20, %v469_v47  ;;  %v488_v29 = vor.u32 %v487_v8, %v484_v11  ;;  %v515_v37 = vshll.u32 %v4938_v18, 16  ;;  %v497_v17 = vrot.slane %v495_v23, 4  ;;  %v4963_v47 = vld [vmem:[%s5771_s1 + $0x10] sm:$0x7f]  }
  0x37   : > { %v475_v44 = vrot.slane %v474_v5, 4  ;;  %v503_v48 = vrot.slane %v501_v24, 5  ;;  %v508_v49 = vrot.slane %v506_v26, 4  ;;  %v511_v52 = vrot.slane %v509_v34, 5  ;;  %v4970_v11 = vld [vmem:[%s4752_s30 + $0x70] sm:$0xf]  ;;  %4593 = vmatprep.subr.msk.bf16.mxu1 %vm802_vm0, %v4963_v47 }
  0x38   : > { %v489_v51 = vrot.slane %v488_v29, 4  ;;  %v517_v53 = vrot.slane %v515_v37, 5  ;;  %v519_v54 = vshrl.u32 %v4938_v18, 16  ;;  %v498_v59 = vor.u32 %v497_v17, %v493_v21  ;;  %v4991_v34 = vld [vmem:[%s4752_s30 + $0x74] sm:$0x1] }
  0x39   : > { %v480_v56 = vsel %vm4789_vm4, %v475_v44, %v479_v10  ;;  %v525_v2 = vshll.u32 %v4952_v33, 16  ;;  %v3539_v4 = vrot.slane %v4768_v13, 9  ;;  %v512_v5 = vor.u32 %v511_v52, %v508_v49 }
  0x3a   : > { %v4972_v20 = vcombine.low %v470_v28, %v480_v56  ;;  %v494_v8 = vsel %vm4789_vm4, %v489_v51, %v493_v21  ;;  %v521_v23 = vrot.slane %v519_v54, 4  ;;  %v499_v13 = vrot.slane %v498_v59, 4 }
  0x3b   : > { %v527_v10 = vrot.slane %v525_v2, 5  ;;  %v1292_v26 = vrot.slane %v4771_v15, 5  ;;  %v530_v28 = vshrl.u32 %v4957_v38, 16  ;;  %v513_v21 = vrot.slane %v512_v5, 4  ;;  %v5004_v2 = vld [vmem:[%s4752_s30 + $0x78] sm:$0xf] }
  0x3c   : > { %5812 = vst [vmem:[#allocation7_spill] sm:$0xff] %v4972_v20  ;;  %4174 = vmatmul.mubr.msk.bf16.gmra.mrb[8].mxu0 %vm753_vm3, %v4972_v20  ;;  %4041 = vmatprep.mubr.msk.bf16.mxu1 %vm753_vm3, %v4972_v20  ;;  %v522_v29 = vor.u32 %v521_v23, %v517_v53  ;;  %v533_v37 = vshll.u32 %v4957_v38, 16  ;;  %v539_v44 = vshll.u32 %v4970_v11, 16  ;;  %v504_v15 = vsel %vm4789_vm4, %v499_v13, %v503_v48  ;;  %v5022_v13 = vld [vmem:[%s4752_s30 + $0x7c] sm:$0xf] }
  0x3d   : > { %v1293_v17 = vsel %vm4978_vm7, %v3539_v4, %v1292_v26  ;;  %v1294_v49 = vrot.slane %v1292_v26, 4  ;;  %v532_v51 = vrot.slane %v530_v28, 4  ;;  %v4999_v52 = vcombine.low %v494_v8, %v504_v15  ;;  %v5035_v15 = vld [vmem:[%s4752_s30 + $0x80] sm:$0x1] }
  0x3e   : > { %v518_v54 = vsel %vm4789_vm4, %v513_v21, %v517_v53  ;;  %v523_v56 = vrot.slane %v522_v29, 4  ;;  %v535_v59 = vrot.slane %v533_v37, 5  ;;  %v541_v5 = vrot.slane %v539_v44, 5 }
  0x3f   : > { %5815 = vst [vmem:[#allocation8_spill] sm:$0xff] %v4999_v52  ;;  %v1296_v48 = vsel %vm4978_vm7, %v1294_v49, %v1295_v42  ;;  %v543_v4 = vshrl.u32 %v4970_v11, 16  ;;  %v549_v23 = vshll.u32 %v4991_v34, 16  ;;  %4177 = vmatprep.mubr.msk.bf16.mxu0 %vm753_vm3, %v4999_v52  ;;  %4042 = vmatmul.mubr.msk.bf16.gmra.mrb[12].mxu1 %vm753_vm3, %v4999_v52  ;;  %v3540_v42 = vrot.slane %v4785_v30, 9 }
  0x40   : > { %v528_v53 = vsel %vm4789_vm4, %v523_v56, %v527_v10  ;;  %v5018_v8 = vcombine.low %v1293_v17, %v1296_v48  ;;  %v536_v16 = vor.u32 %v535_v59, %v532_v51  ;;  %v1301_v29 = vrot.slane %v1299_v61, 4  ;;  %v5054_v48 = vld [vmem:[%s4752_s30 + $0x84] sm:$0xf] }
  0x41   : > { %v5024_v26 = vcombine.low %v518_v54, %v528_v53  ;;  %v545_v28 = vrot.slane %v543_v4, 4  ;;  %v551_v21 = vrot.slane %v549_v23, 5  ;;  %v1300_v10 = vsel %vm4978_vm7, %v3540_v42, %v1299_v61 }
  0x42   : > { %5816 = vst [vmem:[#allocation9_spill] sm:$0xff] %v5018_v8  ;;  %v537_v37 = vrot.slane %v536_v16, 4  ;;  %v2376_v44 = vsel %vm802_vm0, %v4868_v50, 0  ;;  %v554_v17 = vshrl.u32 %v5004_v2, 16  ;;  %v1303_v51 = vsel %vm4978_vm7, %v1301_v29, %v1302_v62  ;;  %v5063_v29 = vld [vmem:[%s4752_s30 + $0x88] sm:$0xf] }
  0x43   : > { %5817 = vst [vmem:[#allocation10_spill] sm:$0xff] %v5024_v26  ;;  %4045 = vmatprep.mubr.msk.bf16.mxu1 %vm753_vm3, %v5024_v26  ;;  %v546_v49 = vor.u32 %v545_v28, %v541_v5  ;;  %v557_v54 = vshll.u32 %v5004_v2, 16  ;;  %v563_v61 = vshll.u32 %v5022_v13, 16  ;;  %v5050_v56 = vcombine.low %v1300_v10, %v1303_v51  ;;  %v5068_v51 = vld [vmem:[%s4752_s30 + $0x8c] sm:$0x1] }
  0x44   : > { %4178 = vmatmul.mubr.msk.bf16.gmra.mrb[12].mxu0 %vm753_vm3, %v5024_v26  ;;  %v542_v50 = vsel %vm4789_vm4, %v537_v37, %v541_v5  ;;  %v556_v59 = vrot.slane %v554_v17, 4  ;;  %v567_v43 = vshrl.u32 %v5022_v13, 16  ;;  %v573_v53 = vshll.u32 %v5035_v15, 16 }
  0x45   : > { %5818 = vst [vmem:[#allocation11_spill] sm:$0xff] %v5050_v56  ;;  %4199 = vmatprep.mubr.msk.bf16.mxu0 %vm753_vm3, %v5018_v8  ;;  %v547_v62 = vrot.slane %v546_v49, 4  ;;  %v559_v4 = vrot.slane %v557_v54, 5  ;;  %v565_v23 = vrot.slane %v563_v61, 5  ;;  %v3541_v42 = vrot.slane %v4814_v58, 9 }
  0x46   : > { %v569_v16 = vrot.slane %v567_v43, 4  ;;  %v1306_v5 = vrot.slane %v4822_v63, 5  ;;  %v1309_v28 = vrot.slane %v4825_v0, 5  ;;  %v575_v17 = vrot.slane %v573_v53, 5  ;;  %v5086_v53 = vld [vmem:[%s5771_s1 + $0x38] sm:$0x7f]  }
  0x47   : > { %v552_v37 = vsel %vm4789_vm4, %v547_v62, %v551_v21  ;;  %v560_v10 = vor.u32 %v559_v4, %v556_v59  ;;  %v578_v49 = vshrl.u32 %v5054_v48, 16  ;;  %v581_v52 = vshll.u32 %v5054_v48, 16  ;;  %5820 = vst [vmem:[#allocation13_spill] sm:$0xff] %v5086_v53 }
  0x48   : > { %v5071_v54 = vcombine.low %v542_v50, %v552_v37  ;;  %v570_v61 = vor.u32 %v569_v16, %v565_v23  ;;  %v1307_v43 = vsel %vm4978_vm7, %v3541_v42, %v1306_v5  ;;  %v1308_v3 = vrot.slane %v1306_v5, 4 }
  0x49   : > { %v561_v0 = vrot.slane %v560_v10, 4  ;;  %v580_v26 = vrot.slane %v578_v49, 4  ;;  %v587_v21 = vshll.u32 %v5063_v29, 16  ;;  %v591_v62 = vshrl.u32 %v5063_v29, 16  ;;  %v5093_v10 = vld [vmem:[%s4752_s30 + $0x90] sm:$0xf] }
  0x4a   : > { %5819 = vst [vmem:[#allocation12_spill] sm:$0xff] %v5071_v54  ;;  %4046 = vmatmul.mubr.msk.bf16.gmra.mrb[16].mxu1 %vm753_vm3, %v5071_v54  ;;  %v571_v59 = vrot.slane %v570_v61, 4  ;;  %v1310_v50 = vsel %vm4978_vm7, %v1308_v3, %v1309_v28  ;;  %v597_v4 = vshll.u32 %v5068_v51, 16  ;;  %v583_v5 = vrot.slane %v581_v52, 5  ;;  %v5096_v3 = vld [vmem:[%s4752_s30 + $0x94] sm:$0xf] }
  0x4b   : > { %v566_v16 = vsel %vm4789_vm4, %v561_v0, %v565_v23  ;;  %v5090_v42 = vcombine.low %v1307_v43, %v1310_v50  ;;  %v589_v37 = vrot.slane %v587_v21, 5  ;;  %v593_v49 = vrot.slane %v591_v62, 4  ;;  %v5110_v50 = vld [vmem:[%s4752_s30 + $0x98] sm:$0x1] }
  0x4c   : > { %4200 = vmatmul.mubr.msk.bf16.vlgmr.msra.gmra.mrb[0].mxu0 %vm753_vm3, %v5050_v56  ;;  %v576_v28 = vsel %vm4789_vm4, %v571_v59, %v575_v17  ;;  %v599_v61 = vrot.slane %v597_v4, 5  ;;  %v3542_v54 = vrot.slane %v4832_v9, 9  ;;  %v584_v52 = vor.u32 %v583_v5, %v580_v26 }
  0x4d   : > { %5821 = vst [vmem:[#allocation14_spill] sm:$0xff] %v5090_v42  ;;  %4232 = vmatpush3.bf16.msra.mxu0 %v2376_v44  ;;  %v5103_v23 = vcombine.low %v566_v16, %v576_v28  ;;  %4203 = vmatprep.mubr.msk.bf16.mxu0 %vm753_vm3, %v5090_v42  ;;  %v1313_v43 = vrot.slane %v4840_v22, 5  ;;  %v1316_v0 = vrot.slane %v4847_v25, 5  ;;  %v594_v21 = vor.u32 %v593_v49, %v589_v37 }
  0x4e   : > { %v602_v17 = vshrl.u32 %v5093_v10, 16  ;;  %v605_v59 = vshll.u32 %v5093_v10, 16  ;;  %v611_v44 = vshll.u32 %v5096_v3, 16  ;;  %4599 = vmatprep.subr.msk.bf16.mxu0 %vm802_vm0, %v5086_v53  ;;  %v585_v26 = vrot.slane %v584_v52, 4 }
  0x4f   : > { %5822 = vst [vmem:[#allocation15_spill] sm:$0xff] %v5103_v23  ;;  %4049 = vmatprep.mubr.msk.bf16.mxu1 %vm753_vm3, %v5103_v23  ;;  %v1314_v25 = vsel %vm4978_vm7, %v3542_v54, %v1313_v43  ;;  %v1315_v62 = vrot.slane %v1313_v43, 4  ;;  %v615_v4 = vshrl.u32 %v5096_v3, 16  ;;  %v595_v16 = vrot.slane %v594_v21, 4 }
  0x50   : > { %v604_v5 = vrot.slane %v602_v17, 4  ;;  %v607_v28 = vrot.slane %v605_v59, 5  ;;  %v613_v49 = vrot.slane %v611_v44, 5  ;;  %v590_v20 = vsel %vm4789_vm4, %v585_v26, %v589_v37  ;;  %v5136_v59 = vld [vmem:[%s4752_s30 + $0xa0] sm:$0xf] }
  0x51   : > { %v1317_v19 = vsel %vm4978_vm7, %v1315_v62, %v1316_v0  ;;  %v617_v23 = vrot.slane %v615_v4, 4  ;;  %v621_v52 = vshll.u32 %v5110_v50, 16  ;;  %v600_v54 = vsel %vm4789_vm4, %v595_v16, %v599_v61  ;;  %v5145_v61 = vld [vmem:[%s4752_s30 + $0xa4] sm:$0x1] }
  0x52   : > { %v5132_v43 = vcombine.low %v1314_v25, %v1317_v19  ;;  %v608_v21 = vor.u32 %v607_v28, %v604_v5  ;;  %v3543_v17 = vrot.slane %v4854_v39, 9  ;;  %v5138_v37 = vcombine.low %v590_v20, %v600_v54 }
  0x53   : > { %v618_v44 = vor.u32 %v617_v23, %v613_v49  ;;  %v623_v0 = vrot.slane %v621_v52, 5  ;;  %v1320_v26 = vrot.slane %v4861_v45, 5  ;;  %v1323_v4 = vrot.slane %v4878_v57, 5 }
  0x54   : > { %5823 = vst [vmem:[#allocation16_spill] sm:$0xff] %v5132_v43  ;;  %5824 = vst [vmem:[#allocation17_spill] sm:$0xff] %v5138_v37  ;;  %4204 = vmatmul.mubr.msk.bf16.gmra.mrb[4].mxu0 %vm753_vm3, %v5132_v43  ;;  %v609_v62 = vrot.slane %v608_v21, 4  ;;  %v626_v19 = vshrl.u32 %v5128_v41, 16  ;;  %v629_v25 = vshll.u32 %v5128_v41, 16  ;;  %4050 = vmatmul.mubr.msk.bf16.gmra.mrb[20].mxu1 %vm753_vm3, %v5138_v37  ;;  %v635_v5 = vshll.u32 %v5136_v59, 16 }
  0x55   : > { %v619_v20 = vrot.slane %v618_v44, 4  ;;  %v1321_v23 = vsel %vm4978_vm7, %v3543_v17, %v1320_v26  ;;  %v1322_v16 = vrot.slane %v1320_v26, 4  ;;  %v639_v54 = vshrl.u32 %v5136_v59, 16  ;;  %v5163_v26 = vld [vmem:[%s4752_s30 + $0xa8] sm:$0xf] }
  0x56   : > { %v614_v57 = vsel %vm4789_vm4, %v609_v62, %v613_v49  ;;  %v628_v28 = vrot.slane %v626_v19, 4  ;;  %v631_v52 = vrot.slane %v629_v25, 5  ;;  %v637_v37 = vrot.slane %v635_v5, 5  ;;  %v5170_v19 = vld [vmem:[%s4752_s30 + $0xac] sm:$0xf] }
  0x57   : > { %v624_v21 = vsel %vm4789_vm4, %v619_v20, %v623_v0  ;;  %v1324_v44 = vsel %vm4978_vm7, %v1322_v16, %v1323_v4  ;;  %v645_v17 = vshll.u32 %v5145_v61, 16  ;;  %v641_v62 = vrot.slane %v639_v54, 4  ;;  %v5180_v5 = vld [vmem:[%s4752_s30 + $0xb0] sm:$0x1] }
  0x58   : > { %v5165_v14 = vcombine.low %v614_v57, %v624_v21  ;;  %v5167_v46 = vcombine.low %v1321_v23, %v1324_v44  ;;  %v632_v49 = vor.u32 %v631_v52, %v628_v28  ;;  %v3544_v0 = vrot.slane %v4883_v1, 9 }
  0x59   : > { %v647_v25 = vrot.slane %v645_v17, 5  ;;  %v1327_v20 = vrot.slane %v4889_v12, 5  ;;  %v1330_v4 = vrot.slane %v4904_v27, 5  ;;  %v642_v23 = vor.u32 %v641_v62, %v637_v37 }
  0x5a   : > { %5825 = vst [vmem:[#allocation18_spill] sm:$0xff] %v5165_v14  ;;  %5826 = vst [vmem:[#allocation19_spill] sm:$0xff] %v5167_v46  ;;  %4053 = vmatprep.mubr.msk.bf16.mxu1 %vm753_vm3, %v5165_v14  ;;  %4207 = vmatprep.mubr.msk.bf16.mxu0 %vm753_vm3, %v5167_v46  ;;  %v633_v16 = vrot.slane %v632_v49, 4  ;;  %v650_v57 = vshrl.u32 %v5163_v26, 16  ;;  %v653_v28 = vshll.u32 %v5163_v26, 16  ;;  %v659_v27 = vshll.u32 %v5170_v19, 16 }
  0x5b   : > { %v1328_v52 = vsel %vm4978_vm7, %v3544_v0, %v1327_v20  ;;  %v1329_v54 = vrot.slane %v1327_v20, 4  ;;  %v663_v21 = vshrl.u32 %v5170_v19, 16  ;;  %v643_v17 = vrot.slane %v642_v23, 4  ;;  %v5194_v20 = vld [vmem:[%s4752_s30 + $0xb4] sm:$0xf] }
  0x5c   : > { %v638_v44 = vsel %vm4789_vm4, %v633_v16, %v637_v37  ;;  %v652_v49 = vrot.slane %v650_v57, 4  ;;  %v655_v62 = vrot.slane %v653_v28, 5  ;;  %v661_v46 = vrot.slane %v659_v27, 5  ;;  %v5202_v16 = vld [vmem:[%s4752_s30 + $0xb8] sm:$0xf] }
  0x5d   : > { %v1331_v14 = vsel %vm4978_vm7, %v1329_v54, %v1330_v4  ;;  %v665_v43 = vrot.slane %v663_v21, 4  ;;  %v669_v0 = vshll.u32 %v5180_v5, 16  ;;  %v648_v42 = vsel %vm4789_vm4, %v643_v17, %v647_v25  ;;  %v5211_v25 = vld [vmem:[%s4752_s30 + $0xbc] sm:$0x1] }
  0x5e   : > { %v5198_v56 = vcombine.low %v1328_v52, %v1331_v14  ;;  %v656_v8 = vor.u32 %v655_v62, %v652_v49  ;;  %v3545_v37 = vrot.slane %v4909_v32, 9  ;;  %v5204_v23 = vcombine.low %v638_v44, %v648_v42 }
  0x5f   : > { %v666_v4 = vor.u32 %v665_v43, %v661_v46  ;;  %v671_v57 = vrot.slane %v669_v0, 5  ;;  %v1334_v28 = vrot.slane %v4914_v40, 5  ;;  %v1337_v27 = vrot.slane %v4928_v55, 5 }
  0x60   : > { %5827 = vst [vmem:[#allocation20_spill] sm:$0xff] %v5198_v56  ;;  %5828 = vst [vmem:[#allocation21_spill] sm:$0xff] %v5204_v23  ;;  %4208 = vmatmul.mubr.msk.bf16.gmra.mrb[8].mxu0 %vm753_vm3, %v5198_v56  ;;  %v657_v54 = vrot.slane %v656_v8, 4  ;;  %v674_v14 = vshrl.u32 %v5194_v20, 16  ;;  %v677_v52 = vshll.u32 %v5194_v20, 16  ;;  %4054 = vmatmul.mubr.msk.bf16.gmra.mrb[24].mxu1 %vm753_vm3, %v5204_v23  ;;  %v683_v44 = vshll.u32 %v5202_v16, 16 }
  0x61   : > { %v667_v42 = vrot.slane %v666_v4, 4  ;;  %v1335_v43 = vsel %vm4978_vm7, %v3545_v37, %v1334_v28  ;;  %v1336_v21 = vrot.slane %v1334_v28, 4  ;;  %v687_v49 = vshrl.u32 %v5202_v16, 16 }
  0x62   : > { %v662_v8 = vsel %vm4789_vm4, %v657_v54, %v661_v46  ;;  %v676_v55 = vrot.slane %v674_v14, 4  ;;  %v679_v17 = vrot.slane %v677_v52, 5  ;;  %v685_v4 = vrot.slane %v683_v44, 5 }
  0x63   : > { %v672_v62 = vsel %vm4789_vm4, %v667_v42, %v671_v57  ;;  %v1338_v0 = vsel %vm4978_vm7, %v1336_v21, %v1337_v27  ;;  %v693_v23 = vshll.u32 %v5211_v25, 16  ;;  %v689_v53 = vrot.slane %v687_v49, 4 }
  0x64   : > { %v5228_v37 = vcombine.low %v662_v8, %v672_v62  ;;  %v5230_v28 = vcombine.low %v1335_v43, %v1338_v0  ;;  %v680_v56 = vor.u32 %v679_v17, %v676_v55  ;;  %v3546_v54 = vrot.slane %v4933_v60, 9 }
  0x65   : > { %v695_v46 = vrot.slane %v693_v23, 5  ;;  %v1341_v14 = vrot.slane %v4938_v18, 5  ;;  %v1344_v52 = vrot.slane %v4952_v33, 5  ;;  %v690_v27 = vor.u32 %v689_v53, %v685_v4 }
  0x66   : > { %4057 = vmatprep.mubr.msk.bf16.mxu1 %vm753_vm3, %v5228_v37  ;;  %4211 = vmatprep.mubr.msk.bf16.mxu0 %vm753_vm3, %v5230_v28  ;;  %v681_v57 = vrot.slane %v680_v56, 4  ;;  %v3547_v42 = vrot.slane %v4957_v38, 9  ;;  %v1348_v43 = vrot.slane %v4970_v11, 5  ;;  %v1351_v44 = vrot.slane %v4991_v34, 5 }
  0x67   : > { %v1342_v23 = vsel %vm4978_vm7, %v3546_v54, %v1341_v14  ;;  %v1343_v21 = vrot.slane %v1341_v14, 4  ;;  %v691_v8 = vrot.slane %v690_v27, 4  ;;  %v3548_v53 = vrot.slane %v5004_v2, 9 }
  0x68   : > { %v686_v33 = vsel %vm4789_vm4, %v681_v57, %v685_v4  ;;  %v1349_v55 = vsel %vm4978_vm7, %v3547_v42, %v1348_v43  ;;  %v1350_v17 = vrot.slane %v1348_v43, 4  ;;  %v1355_v49 = vrot.slane %v5022_v13, 5 }
  0x69   : > { %v1345_v56 = vsel %vm4978_vm7, %v1343_v21, %v1344_v52  ;;  %v1358_v62 = vrot.slane %v5035_v15, 5  ;;  %v696_v34 = vsel %vm4789_vm4, %v691_v8, %v695_v46  ;;  %v3505_v4 = vcombine.low %v4755_v6, %v4758_v7 }
  0x6a   : > { %v5255_v0 = vcombine.low %v1342_v23, %v1345_v56  ;;  %v1352_v54 = vsel %vm4978_vm7, %v1350_v17, %v1351_v44  ;;  %v5261_v14 = vcombine.low %v686_v33, %v696_v34  ;;  %v1357_v57 = vrot.slane %v1355_v49, 4 }
  0x6b   : > { %v5263_v52 = vcombine.low %v1349_v55, %v1352_v54  ;;  %v3549_v15 = vrot.slane %v5054_v48, 9  ;;  %v1362_v46 = vrot.slane %v5063_v29, 5  ;;  %v1365_v27 = vrot.slane %v5068_v51, 5 }
  0x6c   : > { %4212 = vmatmul.mubr.msk.bf16.gmra.mrb[12].mxu0 %vm753_vm3, %v5255_v0  ;;  %4058 = vmatmul.mubr.msk.bf16.gmra.mrb[28].mxu1 %vm753_vm3, %v5261_v14  ;;  %v1356_v6 = vsel %vm4978_vm7, %v3548_v53, %v1355_v49  ;;  %v1359_v7 = vsel %vm4978_vm7, %v1357_v57, %v1358_v62  ;;  %v1369_v42 = vrot.slane %v5096_v3, 5  ;;  %v3550_v23 = vrot.slane %v5093_v10, 9 }
  0x6d   : > { %4215 = vmatprep.mubr.msk.bf16.mxu0 %vm753_vm3, %v5263_v52  ;;  %4063 = vmatprep.mubr.msk.bf16.mxu1 %vm753_vm3, %v3505_v4  ;;  %v1363_v43 = vsel %vm4978_vm7, %v3549_v15, %v1362_v46  ;;  %v1364_v51 = vrot.slane %v1362_v46, 4  ;;  %v1376_v21 = vrot.slane %v5136_v59, 5  ;;  %v5284_v44 = vcombine.low %v1356_v6, %v1359_v7  ;;  %v5302_v4 = vld [vmem:[%s5771_s1 + $0x18] sm:$0x7f]  }
  0x6e   : > { %v1371_v8 = vrot.slane %v1369_v42, 4  ;;  %v1372_v55 = vrot.slane %v5110_v50, 5  ;;  %v3551_v56 = vrot.slane %v5128_v41, 9  ;;  %v1379_v49 = vrot.slane %v5145_v61, 5 }
  0x6f   : > { %v1366_v33 = vsel %vm4978_vm7, %v1364_v51, %v1365_v27  ;;  %v1378_v53 = vrot.slane %v1376_v21, 4  ;;  %v5295_v62 = vcombine.low %v4785_v30, %v4798_v36  ;;  %v1500_v34 = vsel %vm802_vm0, %v4963_v47, 0 }
  0x70   : > { %v5289_v17 = vcombine.low %v1363_v43, %v1366_v33  ;;  %v1370_v50 = vsel %vm4978_vm7, %v3550_v23, %v1369_v42  ;;  %v1373_v61 = vsel %vm4978_vm7, %v1371_v8, %v1372_v55  ;;  %v1383_v30 = vrot.slane %v5170_v19, 5 }
  0x71   : > { %v1377_v36 = vsel %vm4978_vm7, %v3551_v56, %v1376_v21  ;;  %v1380_v47 = vsel %vm4978_vm7, %v1378_v53, %v1379_v49  ;;  %v1390_v54 = vrot.slane %v5202_v16, 5  ;;  %v5324_v57 = vcombine.low %v4814_v58, %v4822_v63 }
  0x72   : > { %v3552_v15 = vrot.slane %v5163_v26, 9  ;;  %v5329_v46 = vcombine.low %v4957_v38, %v4970_v11  ;;  %v5331_v27 = vcombine.low %v1370_v50, %v1373_v61  ;;  %v1386_v6 = vrot.slane %v5180_v5, 5  ;;  %v5349_v5 = vld [vmem:[%s4752_s30 + $0xc4] sm:$0xf] }
  0x73   : > { %v3553_v7 = vrot.slane %v5194_v20, 9  ;;  %v1393_v42 = vrot.slane %v5211_v25, 5  ;;  %v5338_v58 = vcombine.low %v1377_v36, %v1380_v47  ;;  %v1385_v63 = vrot.slane %v1383_v30, 4 }
  0x74   : > { %4216 = vmatmul.mubr.msk.bf16.gmra.mrb[16].mxu0 %vm753_vm3, %v5284_v44  ;;  %4064 = vmatmul.mubr.msk.bf16.vlgmr.msra.gmra.mrb[0].mxu1 %vm753_vm3, %v4795_v35  ;;  %v5342_v43 = vcombine.low %v5004_v2, %v5022_v13  ;;  %v5346_v38 = vcombine.low %v5054_v48, %v5063_v29  ;;  %v1392_v11 = vrot.slane %v1390_v54, 4  ;;  %v5353_v25 = vcombine.low %v5093_v10, %v5096_v3 }
  0x75   : > { %4219 = vmatprep.mubr.msk.bf16.mxu0 %vm753_vm3, %v5289_v17  ;;  %4096 = vmatpush3.bf16.msra.mxu1 %v1500_v34  ;;  %v5357_v51 = vcombine.low %v5128_v41, %v5136_v59  ;;  %v5361_v2 = vcombine.low %v5163_v26, %v5170_v19  ;;  %v5365_v13 = vcombine.low %v4832_v9, %v4840_v22  ;;  %v5376_v41 = vld [vmem:[%s4752_s30 + $0xc0] sm:$0xf]  ;;  %v2144_v10 = vrot.slane %v5349_v5, 5  ;;  %v304_v59 = vld [vmem:[%s4752_s30 + $0xc8] sm:$0x1] }
  0x76   : > { %4067 = vmatprep.mubr.msk.bf16.mxu1 %vm753_vm3, %v5295_v62  ;;  %4594 = vmatprep.subr.msk.bf16.mxu1 %vm802_vm0, %v5302_v4  ;;  %v5369_v48 = vcombine.low %v5194_v20, %v5202_v16  ;;  %v1384_v29 = vsel %vm4978_vm7, %v3552_v15, %v1383_v30  ;;  %v1387_v9 = vsel %vm4978_vm7, %v1385_v63, %v1386_v6  ;;  %v3629_v19 = vrot.slane %v5376_v41, 9 }
  0x77   : > { %v1391_v22 = vsel %vm4978_vm7, %v3553_v7, %v1390_v54  ;;  %v1394_v3 = vsel %vm4978_vm7, %v1392_v11, %v1393_v42  ;;  %v5394_v26 = vcombine.low %v4854_v39, %v4861_v45  ;;  %v5397_v20 = vcombine.low %v1384_v29, %v1387_v9 }
  0x78   : > { %v5399_v16 = vcombine.low %v1391_v22, %v1394_v3  ;;  %v2146_v23 = vrot.slane %v2144_v10, 4  ;;  %v2147_v21 = vrot.slane %v304_v59, 5  ;;  %v1908_v33 = vshrl.u32 %v5376_v41, 16  ;;  %v4655_v22 = vld [vmem:[%s4752_s30] sm:$0xf] }
  0x79   : > { %v1911_v8 = vshll.u32 %v5376_v41, 16  ;;  %v1917_v55 = vshll.u32 %v5349_v5, 16  ;;  %v1921_v56 = vshrl.u32 %v5349_v5, 16  ;;  %v5407_v39 = vcombine.low %v4883_v1, %v4889_v12 }
  0x7a   : > { %v1910_v45 = vrot.slane %v1908_v33, 4  ;;  %v2145_v50 = vsel %vm4978_vm7, %v3629_v19, %v2144_v10  ;;  %v2148_v1 = vsel %vm4978_vm7, %v2146_v23, %v2147_v21  ;;  %v1927_v30 = vshll.u32 %v304_v59, 16  ;;  %v4654_v10 = vld [vmem:[%s4752_s30 + $0x8] sm:$0x1] }
  0x7b   : > { %v1913_v53 = vrot.slane %v1911_v8, 5  ;;  %v1919_v49 = vrot.slane %v1917_v55, 5  ;;  %v1923_v34 = vrot.slane %v1921_v56, 4  ;;  %v5421_v15 = vcombine.low %v2145_v50, %v2148_v1  ;;  %v5830_v8 = vld [vmem:[#allocation9_spill] sm:$0xff]  ;;  %v5831_v55 = vld [vmem:[#allocation11_spill] sm:$0xff]  ;;  %v5835_v1 = vld [vmem:[#allocation20_spill] sm:$0xff] }
  0x7c   : > { %4220 = vmatmul.mubr.msk.bf16.gmra.mrb[20].mxu0 %vm753_vm3, %v5331_v27  ;;  %4068 = vmatmul.mubr.msk.bf16.gmra.mrb[4].mxu1 %vm753_vm3, %v5324_v57  ;;  %v1929_v54 = vrot.slane %v1927_v30, 5  ;;  %v5425_v6 = vcombine.low %v4909_v32, %v4914_v40  ;;  %v5433_v63 = vcombine.low %v4933_v60, %v4938_v18  ;;  %v5829_v32 = vld [vmem:[#allocation13_spill] sm:$0xff]  ;;  %v4652_v60 = vld [vmem:[%s5771_s1 + $0x40] sm:$0x7f]   ;;  %v1288_v9 = vrot.slane %v4654_v10, 5 }
  0x7d   : > { %4223 = vmatprep.mubr.msk.bf16.mxu0 %vm753_vm3, %v5338_v58  ;;  %4071 = vmatprep.mubr.msk.bf16.mxu1 %vm753_vm3, %v5365_v13  ;;  %v1914_v12 = vor.u32 %v1913_v53, %v1910_v45  ;;  %v1924_v61 = vor.u32 %v1923_v34, %v1919_v49  ;;  %v2610_v40 = vsel %vm802_vm0, %v5829_v32, 0  ;;  %v4653_v18 = vld [vmem:[%s4752_s30 + $0x4] sm:$0xf]  ;;  %v3538_v3 = vrot.slane %v4655_v22, 9  ;;  %v5833_v45 = vld [vmem:[#allocation16_spill] sm:$0xff]  ;;  %v5838_v30 = vld [vmem:[#allocation5_spill] sm:$0xff] }
  0x7e   : > { %v1285_v29 = vrot.slane %v4653_v18, 5  ;;  %v1712_v33 = vsel %vm802_vm0, %v5302_v4, 0  ;;  %v4656_v56 = vld [vmem:[%s5771_s1 + $0x20] sm:$0x7f]   ;;  %v5513_v53 = vcombine.low %v5376_v41, %v5349_v5  ;;  %v5522_v34 = vld [vmem:[%s4752_s30 + $0xcc] sm:$0xf] }
  0x7f   : > { %v1915_v36 = vrot.slane %v1914_v12, 4  ;;  %v1925_v47 = vrot.slane %v1924_v61, 4  ;;  %v5832_v4 = vld [vmem:[#allocation14_spill] sm:$0xff]  ;;  %v5525_v50 = vld [vmem:[%s4752_s30 + $0xd0] sm:$0xf]  ;;  %v5836_v41 = vld [vmem:[#allocation3_spill] sm:$0xff] }
  0x80   : > { %v1287_v59 = vrot.slane %v1285_v29, 4  ;;  %v1286_v19 = vsel %vm4978_vm7, %v3538_v3, %v1285_v29  ;;  %v3652_v5 = vcombine.low %v5522_v34, %v5525_v50  ;;  %v2828_v12 = vsel %vm802_vm0, %v4652_v60, 0  ;;  %v5837_v61 = vld [vmem:[#allocation4_spill] sm:$0xff]  ;;  %v5844_v32 = vld [vmem:[#allocation15_spill] sm:$0xff]  ;;  %v5846_v10 = vld [vmem:[#allocation18_spill] sm:$0xff] }
  0x81   : > { %v1920_v7 = vsel %vm4789_vm4, %v1915_v36, %v1919_v49  ;;  %v1930_v42 = vsel %vm4789_vm4, %v1925_v47, %v1929_v54  ;;  %v5834_v49 = vld [vmem:[#allocation19_spill] sm:$0xff]  ;;  %v5839_v36 = vld [vmem:[#allocation6_spill] sm:$0xff]  ;;  %v5841_v54 = vld [vmem:[#allocation8_spill] sm:$0xff]  ;;  %v2575_v18 = vshll.u32 %v5522_v34, 16  ;;  %v2585_v29 = vshrl.u32 %v5525_v50, 16 }
  0x82   : > { %v5435_v11 = vcombine.low %v1920_v7, %v1930_v42  ;;  %v1289_v23 = vsel %vm4978_vm7, %v1287_v59, %v1288_v9  ;;  %v5840_v47 = vld [vmem:[#allocation7_spill] sm:$0xff]  ;;  %v5842_v7 = vld [vmem:[#allocation10_spill] sm:$0xff]  ;;  %v5843_v42 = vld [vmem:[#allocation12_spill] sm:$0xff]  ;;  %v2581_v9 = vshll.u32 %v5525_v50, 16  ;;  %v2808_v31 = vrot.slane %v5525_v50, 5 }
  0x83   : > { %v3556_v21 = vcombine.low %v1286_v19, %v1289_v23  ;;  %v5847_v22 = vld [vmem:[#allocation2_spill] sm:$0xff]  ;;  %v2577_v3 = vrot.slane %v2575_v18, 5  ;;  %v2587_v19 = vrot.slane %v2585_v29, 4  ;;  %v307_v23 = vld [vmem:[%s4752_s30 + $0xd4] sm:$0x1]  ;;  %s251_s30 = scalar_lea.vmem %s5774_s4, %s3469_s27 }
  0x84   : > { %4224 = vmatmul.mubr.msk.bf16.gmra.mrb[24].mxu0 %vm753_vm3, %v5397_v20  ;;  %4072 = vmatmul.mubr.msk.bf16.gmra.mrb[8].mxu1 %vm753_vm3, %v5394_v26  ;;  %v2583_v59 = vrot.slane %v2581_v9, 5 }
  0x85   : > { %4227 = vmatprep.mubr.msk.bf16.mxu0 %vm753_vm3, %v5399_v16  ;;  %4075 = vmatprep.mubr.msk.bf16.mxu1 %vm753_vm3, %v5407_v39 }
  0x8c   : > { %4228 = vmatmul.mubr.msk.bf16.gmra.mrb[28].mxu0 %vm753_vm3, %v5421_v15  ;;  %4076 = vmatmul.mubr.msk.bf16.gmra.mrb[12].mxu1 %vm753_vm3, %v5425_v6 }
  0x8d   : > { %4233 = vmatprep.mubr.msk.bf16.mxu0 %vm753_vm3, %v5295_v62  ;;  %4079 = vmatprep.mubr.msk.bf16.mxu1 %vm753_vm3, %v5433_v63 }
  0x94   : > { %4234 = vmatmul.mubr.msk.bf16.vlgmr.msra.gmra.mrb[0].mxu0 %vm753_vm3, %v5324_v57  ;;  %4080 = vmatmul.mubr.msk.bf16.gmra.mrb[16].mxu1 %vm753_vm3, %v5329_v46 }
  0x95   : > { %4266 = vmatpush3.bf16.msra.mxu0 %v2610_v40  ;;  %4083 = vmatprep.mubr.msk.bf16.mxu1 %vm753_vm3, %v5342_v43  ;;  %v5845_v40 = vld [vmem:[#allocation17_spill] sm:$0xff] }
  0x96   : > { %4237 = vmatprep.mubr.msk.bf16.mxu0 %vm753_vm3, %v5365_v13  ;;  %4600 = vmatprep.subr.msk.bf16.mxu0 %vm802_vm0, %v4652_v60  ;;  %v2572_v60 = vshrl.u32 %v5522_v34, 16 }
  0x9c   : > { %4238 = vmatmul.mubr.msk.bf16.gmra.mrb[4].mxu0 %vm753_vm3, %v5394_v26  ;;  %4084 = vmatmul.mubr.msk.bf16.gmra.mrb[20].mxu1 %vm753_vm3, %v5346_v38 }
  0x9d   : > { %4241 = vmatprep.mubr.msk.bf16.mxu0 %vm753_vm3, %v5407_v39  ;;  %4087 = vmatprep.mubr.msk.bf16.mxu1 %vm753_vm3, %v5353_v25 }
  0xa4   : > { %4242 = vmatmul.mubr.msk.bf16.gmra.mrb[8].mxu0 %vm753_vm3, %v5425_v6  ;;  %4088 = vmatmul.mubr.msk.bf16.gmra.mrb[24].mxu1 %vm753_vm3, %v5357_v51 }
  0xa5   : > { %4245 = vmatprep.mubr.msk.bf16.mxu0 %vm753_vm3, %v5433_v63  ;;  %4091 = vmatprep.mubr.msk.bf16.mxu1 %vm753_vm3, %v5361_v2 }
  0xac   : > { %4246 = vmatmul.mubr.msk.bf16.gmra.mrb[12].mxu0 %vm753_vm3, %v5329_v46  ;;  %4092 = vmatmul.mubr.msk.bf16.gmra.mrb[28].mxu1 %vm753_vm3, %v5369_v48 }
  0xad   : > { %4249 = vmatprep.mubr.msk.bf16.mxu0 %vm753_vm3, %v5342_v43  ;;  %4097 = vmatprep.mubr.msk.bf16.mxu1 %vm753_vm3, %v3556_v21  ;;  %v5848_v21 = vld [vmem:[#allocation21_spill] sm:$0xff] }
  0xb4   : > { %4250 = vmatmul.mubr.msk.bf16.gmra.mrb[16].mxu0 %vm753_vm3, %v5346_v38  ;;  %4098 = vmatmul.mubr.msk.bf16.vlgmr.msra.gmra.mrb[0].mxu1 %vm753_vm3, %v5830_v8  ;;  %v2591_v8 = vshll.u32 %v307_v23, 16 }
  0xb5   : > { %4253 = vmatprep.mubr.msk.bf16.mxu0 %vm753_vm3, %v5353_v25  ;;  %4130 = vmatpush3.bf16.msra.mxu1 %v1712_v33  ;;  %v2588_v33 = vor.u32 %v2587_v19, %v2583_v59 }
  0xb6   : > { %4101 = vmatprep.mubr.msk.bf16.mxu1 %vm753_vm3, %v5831_v55  ;;  %4596 = vmatprep.subr.msk.bf16.mxu1 %vm802_vm0, %v4656_v56 }
  0xb7   : > { %v2589_v56 = vrot.slane %v2588_v33, 4 }
  0xbc   : > { %4254 = vmatmul.mubr.msk.bf16.gmra.mrb[20].mxu0 %vm753_vm3, %v5357_v51  ;;  %4102 = vmatmul.mubr.msk.bf16.gmra.mrb[4].mxu1 %vm753_vm3, %v5832_v4 }
  0xbd   : > { %4257 = vmatprep.mubr.msk.bf16.mxu0 %vm753_vm3, %v5361_v2  ;;  %4105 = vmatprep.mubr.msk.bf16.mxu1 %vm753_vm3, %v5833_v45 }
  0xc4   : > { %4258 = vmatmul.mubr.msk.bf16.gmra.mrb[24].mxu0 %vm753_vm3, %v5369_v48  ;;  %4106 = vmatmul.mubr.msk.bf16.gmra.mrb[8].mxu1 %vm753_vm3, %v5834_v49 }
  0xc5   : > { %4261 = vmatprep.mubr.msk.bf16.mxu0 %vm753_vm3, %v5513_v53  ;;  %4109 = vmatprep.mubr.msk.bf16.mxu1 %vm753_vm3, %v5835_v1 }
  0xcc   : > { %4262 = vmatmul.mubr.msk.bf16.gmra.mrb[28].mxu0 %vm753_vm3, %v3652_v5  ;;  %4110 = vmatmul.mubr.msk.bf16.gmra.mrb[12].mxu1 %vm753_vm3, %v5230_v28  ;;  %v2593_v5 = vrot.slane %v2591_v8, 5 }
  0xcd   : > { %4267 = vmatprep.mubr.msk.bf16.mxu0 %vm753_vm3, %v5836_v41  ;;  %4113 = vmatprep.mubr.msk.bf16.mxu1 %vm753_vm3, %v5255_v0 }
  0xce   : > { %v2594_v41 = vsel %vm4789_vm4, %v2589_v56, %v2593_v5 }
  0xd4   : > { %4268 = vmatmul.mubr.msk.bf16.vlgmr.msra.gmra.mrb[0].mxu0 %vm753_vm3, %v5837_v61  ;;  %4114 = vmatmul.mubr.msk.bf16.gmra.mrb[16].mxu1 %vm753_vm3, %v5263_v52 }
  0xd5   : > { %4300 = vmatpush3.bf16.msra.mxu0 %v2828_v12  ;;  %4117 = vmatprep.mubr.msk.bf16.mxu1 %vm753_vm3, %v5284_v44 }
  0xd6   : > { %4271 = vmatprep.mubr.msk.bf16.mxu0 %vm753_vm3, %v5838_v30 }
  0xdc   : > { %4272 = vmatmul.mubr.msk.bf16.gmra.mrb[4].mxu0 %vm753_vm3, %v5839_v36  ;;  %4118 = vmatmul.mubr.msk.bf16.gmra.mrb[20].mxu1 %vm753_vm3, %v5289_v17 }
  0xdd   : > { %4275 = vmatprep.mubr.msk.bf16.mxu0 %vm753_vm3, %v5840_v47  ;;  %4121 = vmatprep.mubr.msk.bf16.mxu1 %vm753_vm3, %v5331_v27 }
  0xe4   : > { %4276 = vmatmul.mubr.msk.bf16.gmra.mrb[8].mxu0 %vm753_vm3, %v5841_v54  ;;  %4122 = vmatmul.mubr.msk.bf16.gmra.mrb[24].mxu1 %vm753_vm3, %v5338_v58 }
  0xe5   : > { %4279 = vmatprep.mubr.msk.bf16.mxu0 %vm753_vm3, %v5842_v7  ;;  %4125 = vmatprep.mubr.msk.bf16.mxu1 %vm753_vm3, %v5397_v20 }
  0xec   : > { %4280 = vmatmul.mubr.msk.bf16.gmra.mrb[12].mxu0 %vm753_vm3, %v5843_v42  ;;  %4126 = vmatmul.mubr.msk.bf16.gmra.mrb[28].mxu1 %vm753_vm3, %v5399_v16 }
  0xed   : > { %4283 = vmatprep.mubr.msk.bf16.mxu0 %vm753_vm3, %v5844_v32  ;;  %4131 = vmatprep.mubr.msk.bf16.mxu1 %vm753_vm3, %v4795_v35  ;;  %v2574_v35 = vrot.slane %v2572_v60, 4 }
  0xf4   : > { %4284 = vmatmul.mubr.msk.bf16.gmra.mrb[16].mxu0 %vm753_vm3, %v5845_v40  ;;  %4132 = vmatmul.mubr.msk.bf16.vlgmr.msra.gmra.mrb[0].mxu1 %vm753_vm3, %v5295_v62  ;;  %v2578_v62 = vor.u32 %v2577_v3, %v2574_v35 }
  0xf5   : > { %4287 = vmatprep.mubr.msk.bf16.mxu0 %vm753_vm3, %v5846_v10  ;;  %4334 = vmatpush3.bf16.msra.mxu1 %v5847_v22 }
  0xf6   : > { %4135 = vmatprep.mubr.msk.bf16.mxu1 %vm753_vm3, %v5324_v57  ;;  %v2579_v57 = vrot.slane %v2578_v62, 4 }
  0xfc   : > { %4288 = vmatmul.mubr.msk.bf16.gmra.mrb[20].mxu0 %vm753_vm3, %v5848_v21  ;;  %4136 = vmatmul.mubr.msk.bf16.gmra.mrb[4].mxu1 %vm753_vm3, %v5365_v13  ;;  %v2584_v13 = vsel %vm4789_vm4, %v2579_v57, %v2583_v59 }
  0xfd   : > { %4291 = vmatprep.mubr.msk.bf16.mxu0 %vm753_vm3, %v5228_v37  ;;  %4139 = vmatprep.mubr.msk.bf16.mxu1 %vm753_vm3, %v5394_v26  ;;  %v3672_v26 = vcombine.low %v2584_v13, %v2594_v41 }
 0x104   : > { %4292 = vmatmul.mubr.msk.bf16.gmra.mrb[24].mxu0 %vm753_vm3, %v5261_v14  ;;  %4140 = vmatmul.mubr.msk.bf16.gmra.mrb[8].mxu1 %vm753_vm3, %v5407_v39 }
 0x105   : > { %4295 = vmatprep.mubr.msk.bf16.mxu0 %vm753_vm3, %v5435_v11  ;;  %4143 = vmatprep.mubr.msk.bf16.mxu1 %vm753_vm3, %v5425_v6 }
 0x10c   : > { %4296 = vmatmul.mubr.msk.bf16.gmra.mrb[28].mxu0 %vm753_vm3, %v3672_v26  ;;  %4144 = vmatmul.mubr.msk.bf16.gmra.mrb[12].mxu1 %vm753_vm3, %v5433_v63 }
 0x10d   : > { %4301 = vmatprep.mubr.msk.bf16.mxu0 %vm753_vm3, %v5831_v55  ;;  %4147 = vmatprep.mubr.msk.bf16.mxu1 %vm753_vm3, %v5329_v46  ;;  %v5694_v55 = vld [vmem:[%s5772_s2] ss:$0 sm:$0xff] }
 0x114   : > { %4302 = vmatmul.mubr.msk.bf16.vlgmr.msra.gmra.mrb[0].mxu0 %vm753_vm3, %v5832_v4  ;;  %4148 = vmatmul.mubr.msk.bf16.gmra.mrb[16].mxu1 %vm753_vm3, %v5342_v43 }
 0x115   : > { %4305 = vmatprep.mubr.msk.bf16.mxu0 %vm753_vm3, %v5833_v45  ;;  %4151 = vmatprep.mubr.msk.bf16.mxu1 %vm753_vm3, %v5346_v38 }
 0x11c   : > { %4306 = vmatmul.mubr.msk.bf16.gmra.mrb[4].mxu0 %vm753_vm3, %v5834_v49  ;;  %4152 = vmatmul.mubr.msk.bf16.gmra.mrb[20].mxu1 %vm753_vm3, %v5353_v25 }
 0x11d   : > { %4309 = vmatprep.mubr.msk.bf16.mxu0 %vm753_vm3, %v5835_v1  ;;  %4155 = vmatprep.mubr.msk.bf16.mxu1 %vm753_vm3, %v5357_v51 }
 0x124   : > { %4310 = vmatmul.mubr.msk.bf16.gmra.mrb[8].mxu0 %vm753_vm3, %v5230_v28  ;;  %4156 = vmatmul.mubr.msk.bf16.gmra.mrb[24].mxu1 %vm753_vm3, %v5361_v2  ;;  %v3690_v28 = vrot.slane %v5522_v34, 9 }
 0x125   : > { %4313 = vmatprep.mubr.msk.bf16.mxu0 %vm753_vm3, %v5255_v0  ;;  %4159 = vmatprep.mubr.msk.bf16.mxu1 %vm753_vm3, %v5369_v48  ;;  %v2810_v0 = vrot.slane %v2808_v31, 4 }
 0x12c   : > { %4314 = vmatmul.mubr.msk.bf16.gmra.mrb[12].mxu0 %vm753_vm3, %v5263_v52  ;;  %4160 = vmatmul.mubr.msk.bf16.gmra.mrb[28].mxu1 %vm753_vm3, %v5513_v53  ;;  %v2811_v52 = vrot.slane %v307_v23, 5 }
 0x12d   : > { %4317 = vmatprep.mubr.msk.bf16.mxu0 %vm753_vm3, %v5284_v44  ;;  %4181 = vmatprep.mubr.msk.bf16.mxu1 %vm753_vm3, %v5843_v42  ;;  %v2809_v44 = vsel %vm4978_vm7, %v3690_v28, %v2808_v31 }
 0x134   : > { %4318 = vmatmul.mubr.msk.bf16.gmra.mrb[16].mxu0 %vm753_vm3, %v5289_v17  ;;  %4182 = vmatmul.mubr.msk.bf16.vlgmr.msra.gmra.mrb[16].mxu1 %vm753_vm3, %v5844_v32  ;;  %v2812_v17 = vsel %vm4978_vm7, %v2810_v0, %v2811_v52 }
 0x135   : > { %4321 = vmatprep.mubr.msk.bf16.mxu0 %vm753_vm3, %v5331_v27  ;;  %4185 = vmatprep.mubr.msk.bf16.mxu1 %vm753_vm3, %v5845_v40  ;;  %v3693_v46 = vcombine.low %v2809_v44, %v2812_v17 }
 0x13c   : > { %4322 = vmatmul.mubr.msk.bf16.gmra.mrb[20].mxu0 %vm753_vm3, %v5338_v58  ;;  %4186 = vmatmul.mubr.msk.bf16.gmra.mrb[20].mxu1 %vm753_vm3, %v5846_v10 }
 0x13d   : > { %4325 = vmatprep.mubr.msk.bf16.mxu0 %vm753_vm3, %v5397_v20  ;;  %4189 = vmatprep.mubr.msk.bf16.mxu1 %vm753_vm3, %v5848_v21 }
 0x144   : > { %4326 = vmatmul.mubr.msk.bf16.gmra.mrb[24].mxu0 %vm753_vm3, %v5399_v16  ;;  %4190 = vmatmul.mubr.msk.bf16.gmra.mrb[24].mxu1 %vm753_vm3, %v5228_v37 }
 0x145   : > { %4329 = vmatprep.mubr.msk.bf16.mxu0 %vm753_vm3, %v5421_v15  ;;  %4193 = vmatprep.mubr.msk.bf16.mxu1 %vm753_vm3, %v5261_v14 }
 0x14c   : > { %4330 = vmatmul.mubr.msk.bf16.gmra.mrb[28].mxu0 %vm753_vm3, %v3693_v46  ;;  %4194 = vmatmul.mubr.msk.bf16.gmra.mrb[28].mxu1 %vm753_vm3, %v5435_v11 }
 0x1c7   : > { %v4133_v27 = vpop.f32.mrb[0].mxu1 }
 0x1c8   : > { %v1748_v37 = vpop.f32.mrb[1].mxu1 }
 0x1c9   : > { %v4134_v58 = vpop.f32.mrb[2].mxu1 }
 0x1ca   : > { %v1751_v43 = vpop.f32.mrb[3].mxu1 }
 0x1cf   : > { %v4137_v38 = vpop.f32.mrb[4].mxu1 }
 0x1d0   : > { %v1764_v25 = vpop.f32.mrb[5].mxu1 }
 0x1d1   : > { %v4138_v51 = vpop.f32.mrb[6].mxu1 }
 0x1d2   : > { %v1767_v2 = vpop.f32.mrb[7].mxu1 }
 0x1d7   : > { %v4141_v24 = vpop.f32.mrb[8].mxu1 }
 0x1d8   : > { %v5677_v48 = vpop.f32.mrb[9].mxu1 }
 0x1d9   : > { %v5679_v20 = vpop.f32.mrb[10].mxu1 }
 0x1da   : > { %v5681_v14 = vpop.f32.mrb[11].mxu1 }
 0x1df   : > { %v5683_v16 = vpop.f32.mrb[12].mxu1 }
 0x1e0   : > { %v5685_v39 = vpop.f32.mrb[13].mxu1 }
 0x1e1   : > { %v5687_v15 = vpop.f32.mrb[14].mxu1 }
 0x1e2   : > { %v5689_v6 = vpop.f32.mrb[15].mxu1 }
 0x1e7   : > { %v4303_v63 = vpop.f32.mrb[0].mxu0 }
 0x1e8   : > { %v4335_v11 = vadd.f32 %v4303_v63, %v4133_v27  ;;  %v2864_v4 = vpop.f32.mrb[1].mxu0 }
 0x1e9   : > { %v4336_v45 = vadd.f32 %v2864_v4, %v1748_v37  ;;  %v4304_v53 = vpop.f32.mrb[2].mxu0 }
 0x1ea   : > { %v4337_v49 = vadd.f32 %v4304_v53, %v4134_v58  ;;  %v2867_v34 = vpop.f32.mrb[3].mxu0  ;;  %v3032_v12 = vadd.f32 %v4335_v11, %v5694_v55 }
 0x1eb   : > { %v3030_v50 = vadd.f32 %v4336_v45, %v5694_v55  ;;  %v4338_v1 = vadd.f32 %v2867_v34, %v1751_v43 }
 0x1ec   : > { %v3033_v61 = vadd.f32 %v4337_v49, %v5694_v55  ;;  %v3261_v18 = vmul.f32 %v3032_v12, %v3032_v12 }
 0x1ed   : > { %v3031_v30 = vadd.f32 %v4338_v1, %v5694_v55  ;;  %v3259_v47 = vmul.f32 %v3030_v50, %v3030_v50 }
 0x1ee   : > { %v3787_v36 = vpack.c.bf16 %v3033_v61, %v3032_v12  ;;  %v3262_v35 = vmul.f32 %v3033_v61, %v3033_v61 }
 0x1ef   : > { %v3782_v54 = vpack.c.bf16 %v3031_v30, %v3030_v50  ;;  %v3222_v7 = vadd.f32 %v3031_v30, %v3030_v50  ;;  %v3260_v42 = vmul.f32 %v3031_v30, %v3031_v30  ;;  %v4307_v32 = vpop.f32.mrb[4].mxu0 }
 0x1f0   : > { %3859 = vst [vmem:[%s5703_s26 + $0x8] sm:$0xff] %v3787_v36   ;;  %v4339_v40 = vadd.f32 %v4307_v32, %v4137_v38  ;;  %v2880_v60 = vpop.f32.mrb[5].mxu0 }
 0x1f1   : > { %3783 = vst [vmem:[%s5703_s26] sm:$0xff] %v3782_v54   ;;  %v3223_v29 = vadd.f32 %v3222_v7, %v3032_v12  ;;  %v3291_v10 = vadd.f32 %v3260_v42, %v3259_v47  ;;  %v4340_v9 = vadd.f32 %v2880_v60, %v1764_v25  ;;  %v4308_v22 = vpop.f32.mrb[6].mxu0 }
 0x1f2   : > { %v4341_v3 = vadd.f32 %v4308_v22, %v4138_v51  ;;  %v2883_v59 = vpop.f32.mrb[7].mxu0  ;;  %v3036_v33 = vadd.f32 %v4339_v40, %v5694_v55 }
 0x1f3   : > { %v3292_v19 = vadd.f32 %v3291_v10, %v3261_v18  ;;  %v3034_v23 = vadd.f32 %v4340_v9, %v5694_v55  ;;  %v3224_v21 = vadd.f32 %v3223_v29, %v3033_v61  ;;  %v4342_v62 = vadd.f32 %v2883_v59, %v1767_v2 }
 0x1f4   : > { %v3037_v8 = vadd.f32 %v4341_v3, %v5694_v55  ;;  %v3265_v46 = vmul.f32 %v3036_v33, %v3036_v33 }
 0x1f5   : > { %v3225_v57 = vadd.f32 %v3224_v21, %v3034_v23  ;;  %v3263_v56 = vmul.f32 %v3034_v23, %v3034_v23  ;;  %v3293_v5 = vadd.f32 %v3292_v19, %v3262_v35  ;;  %v3035_v13 = vadd.f32 %v4342_v62, %v5694_v55 }
 0x1f6   : > { %v3797_v41 = vpack.c.bf16 %v3037_v8, %v3036_v33  ;;  %v3266_v38 = vmul.f32 %v3037_v8, %v3037_v8 }
 0x1f7   : > { %v3294_v26 = vadd.f32 %v3293_v5, %v3263_v56  ;;  %v3792_v31 = vpack.c.bf16 %v3035_v13, %v3034_v23  ;;  %v3226_v28 = vadd.f32 %v3225_v57, %v3035_v13  ;;  %v3264_v0 = vmul.f32 %v3035_v13, %v3035_v13  ;;  %v4311_v52 = vpop.f32.mrb[8].mxu0 }
 0x1f8   : > { %3861 = vst [vmem:[%s5703_s26 + $0x18] sm:$0xff] %v3797_v41   ;;  %v4343_v44 = vadd.f32 %v4311_v52, %v4141_v24  ;;  %v2896_v17 = vpop.f32.mrb[9].mxu0 }
 0x1f9   : > { %3860 = vst [vmem:[%s5703_s26 + $0x10] sm:$0xff] %v3792_v31   ;;  %v3227_v27 = vadd.f32 %v3226_v28, %v3036_v33  ;;  %v3295_v37 = vadd.f32 %v3294_v26, %v3264_v0  ;;  %v4344_v58 = vadd.f32 %v2896_v17, %v5677_v48  ;;  %v4312_v43 = vpop.f32.mrb[10].mxu0 }
 0x1fa   : > { %v4345_v25 = vadd.f32 %v4312_v43, %v5679_v20  ;;  %v2899_v51 = vpop.f32.mrb[11].mxu0  ;;  %v3040_v24 = vadd.f32 %v4343_v44, %v5694_v55 }
 0x1fb   : > { %v3296_v2 = vadd.f32 %v3295_v37, %v3265_v46  ;;  %v3038_v63 = vadd.f32 %v4344_v58, %v5694_v55  ;;  %v3228_v11 = vadd.f32 %v3227_v27, %v3037_v8  ;;  %v4346_v4 = vadd.f32 %v2899_v51, %v5681_v14 }
 0x1fc   : > { %v3041_v45 = vadd.f32 %v4345_v25, %v5694_v55  ;;  %v3269_v47 = vmul.f32 %v3040_v24, %v3040_v24 }
 0x1fd   : > { %v3229_v53 = vadd.f32 %v3228_v11, %v3038_v63  ;;  %v3267_v49 = vmul.f32 %v3038_v63, %v3038_v63  ;;  %v3297_v48 = vadd.f32 %v3296_v2, %v3266_v38  ;;  %v3039_v34 = vadd.f32 %v4346_v4, %v5694_v55 }
 0x1fe   : > { %v3807_v50 = vpack.c.bf16 %v3041_v45, %v3040_v24  ;;  %v3270_v40 = vmul.f32 %v3041_v45, %v3041_v45 }
 0x1ff   : > { %v3298_v20 = vadd.f32 %v3297_v48, %v3267_v49  ;;  %v3802_v1 = vpack.c.bf16 %v3039_v34, %v3038_v63  ;;  %v3230_v12 = vadd.f32 %v3229_v53, %v3039_v34  ;;  %v3268_v61 = vmul.f32 %v3039_v34, %v3039_v34  ;;  %v4315_v30 = vpop.f32.mrb[12].mxu0 }
 0x200   : > { %3863 = vst [vmem:[%s5703_s26 + $0x28] sm:$0xff] %v3807_v50   ;;  %v4347_v36 = vadd.f32 %v4315_v30, %v5683_v16  ;;  %v2912_v14 = vpop.f32.mrb[13].mxu0 }
 0x201   : > { %3862 = vst [vmem:[%s5703_s26 + $0x20] sm:$0xff] %v3802_v1   ;;  %v3231_v54 = vadd.f32 %v3230_v12, %v3040_v24  ;;  %v3299_v7 = vadd.f32 %v3298_v20, %v3268_v61  ;;  %v4348_v42 = vadd.f32 %v2912_v14, %v5685_v39  ;;  %v4316_v32 = vpop.f32.mrb[14].mxu0 }
 0x202   : > { %v4349_v60 = vadd.f32 %v4316_v32, %v5687_v15  ;;  %v2915_v18 = vpop.f32.mrb[15].mxu0  ;;  %v3044_v16 = vadd.f32 %v4347_v36, %v5694_v55 }
 0x203   : > { %v3300_v29 = vadd.f32 %v3299_v7, %v3269_v47  ;;  %v3042_v10 = vadd.f32 %v4348_v42, %v5694_v55  ;;  %v3232_v9 = vadd.f32 %v3231_v54, %v3041_v45  ;;  %v4350_v22 = vadd.f32 %v2915_v18, %v5689_v6 }
 0x204   : > { %v3045_v35 = vadd.f32 %v4349_v60, %v5694_v55  ;;  %v3273_v6 = vmul.f32 %v3044_v16, %v3044_v16 }
 0x205   : > { %v3233_v3 = vadd.f32 %v3232_v9, %v3042_v10  ;;  %v3271_v59 = vmul.f32 %v3042_v10, %v3042_v10  ;;  %v3301_v39 = vadd.f32 %v3300_v29, %v3270_v40  ;;  %v3043_v19 = vadd.f32 %v4350_v22, %v5694_v55 }
 0x206   : > { %v3817_v23 = vpack.c.bf16 %v3045_v35, %v3044_v16  ;;  %v3274_v44 = vmul.f32 %v3045_v35, %v3045_v35 }
 0x207   : > { %v3302_v15 = vadd.f32 %v3301_v39, %v3271_v59  ;;  %v3812_v21 = vpack.c.bf16 %v3043_v19, %v3042_v10  ;;  %v3234_v62 = vadd.f32 %v3233_v3, %v3043_v19  ;;  %v3272_v33 = vmul.f32 %v3043_v19, %v3043_v19  ;;  %v4319_v8 = vpop.f32.mrb[16].mxu0  ;;  %v4183_v57 = vpop.f32.mrb[16].mxu1 }
 0x208   : > { %3865 = vst [vmem:[%s5703_s26 + $0x38] sm:$0xff] %v3817_v23   ;;  %v2928_v56 = vpop.f32.mrb[17].mxu0  ;;  %v4351_v41 = vadd.f32 %v4319_v8, %v4183_v57  ;;  %v2046_v26 = vpop.f32.mrb[17].mxu1 }
 0x209   : > { %3864 = vst [vmem:[%s5703_s26 + $0x30] sm:$0xff] %v3812_v21   ;;  %v3235_v5 = vadd.f32 %v3234_v62, %v3044_v16  ;;  %v3303_v13 = vadd.f32 %v3302_v15, %v3272_v33  ;;  %v4320_v31 = vpop.f32.mrb[18].mxu0  ;;  %v4352_v28 = vadd.f32 %v2928_v56, %v2046_v26  ;;  %v4184_v0 = vpop.f32.mrb[18].mxu1 }
 0x20a   : > { %v2931_v52 = vpop.f32.mrb[19].mxu0  ;;  %v4353_v27 = vadd.f32 %v4320_v31, %v4184_v0  ;;  %v2049_v37 = vpop.f32.mrb[19].mxu1  ;;  %v3048_v38 = vadd.f32 %v4351_v41, %v5694_v55 }
 0x20b   : > { %v3304_v17 = vadd.f32 %v3303_v13, %v3273_v6  ;;  %v3236_v46 = vadd.f32 %v3235_v5, %v3045_v35  ;;  %v3046_v58 = vadd.f32 %v4352_v28, %v5694_v55  ;;  %v4354_v43 = vadd.f32 %v2931_v52, %v2049_v37 }
 0x20c   : > { %v3049_v51 = vadd.f32 %v4353_v27, %v5694_v55  ;;  %v3277_v61 = vmul.f32 %v3048_v38, %v3048_v38 }
 0x20d   : > { %v3305_v25 = vadd.f32 %v3304_v17, %v3274_v44  ;;  %v3237_v2 = vadd.f32 %v3236_v46, %v3046_v58  ;;  %v3275_v63 = vmul.f32 %v3046_v58, %v3046_v58  ;;  %v3047_v11 = vadd.f32 %v4354_v43, %v5694_v55 }
 0x20e   : > { %v3827_v4 = vpack.c.bf16 %v3049_v51, %v3048_v38  ;;  %v3278_v7 = vmul.f32 %v3049_v51, %v3049_v51 }
 0x20f   : > { %v4323_v24 = vpop.f32.mrb[20].mxu0  ;;  %v3306_v45 = vadd.f32 %v3305_v25, %v3275_v63  ;;  %v3822_v53 = vpack.c.bf16 %v3047_v11, %v3046_v58  ;;  %v3238_v49 = vadd.f32 %v3237_v2, %v3047_v11  ;;  %v3276_v48 = vmul.f32 %v3047_v11, %v3047_v11  ;;  %v4187_v34 = vpop.f32.mrb[20].mxu1 }
 0x210   : > { %v2944_v50 = vpop.f32.mrb[21].mxu0  ;;  %3867 = vst [vmem:[%s5703_s26 + $0x48] sm:$0xff] %v3827_v4   ;;  %v4355_v20 = vadd.f32 %v4323_v24, %v4187_v34  ;;  %v2062_v1 = vpop.f32.mrb[21].mxu1 }
 0x211   : > { %v4324_v12 = vpop.f32.mrb[22].mxu0  ;;  %3866 = vst [vmem:[%s5703_s26 + $0x40] sm:$0xff] %v3822_v53   ;;  %v3239_v30 = vadd.f32 %v3238_v49, %v3048_v38  ;;  %v3307_v36 = vadd.f32 %v3306_v45, %v3276_v48  ;;  %v4356_v14 = vadd.f32 %v2944_v50, %v2062_v1  ;;  %v4188_v47 = vpop.f32.mrb[22].mxu1 }
 0x212   : > { %v2947_v54 = vpop.f32.mrb[23].mxu0  ;;  %v4357_v42 = vadd.f32 %v4324_v12, %v4188_v47  ;;  %v2065_v32 = vpop.f32.mrb[23].mxu1  ;;  %v3052_v10 = vadd.f32 %v4355_v20, %v5694_v55 }
 0x213   : > { %v3308_v40 = vadd.f32 %v3307_v36, %v3277_v61  ;;  %v3050_v60 = vadd.f32 %v4356_v14, %v5694_v55  ;;  %v3240_v18 = vadd.f32 %v3239_v30, %v3049_v51  ;;  %v4358_v29 = vadd.f32 %v2947_v54, %v2065_v32 }
 0x214   : > { %v3053_v9 = vadd.f32 %v4357_v42, %v5694_v55  ;;  %v3281_v6 = vmul.f32 %v3052_v10, %v3052_v10 }
 0x215   : > { %v3241_v22 = vadd.f32 %v3240_v18, %v3050_v60  ;;  %v3279_v16 = vmul.f32 %v3050_v60, %v3050_v60  ;;  %v3309_v35 = vadd.f32 %v3308_v40, %v3278_v7  ;;  %v3051_v3 = vadd.f32 %v4358_v29, %v5694_v55 }
 0x216   : > { %v3837_v59 = vpack.c.bf16 %v3053_v9, %v3052_v10  ;;  %v3282_v28 = vmul.f32 %v3053_v9, %v3053_v9 }
 0x217   : > { %v4327_v39 = vpop.f32.mrb[24].mxu0  ;;  %v3310_v19 = vadd.f32 %v3309_v35, %v3279_v16  ;;  %v3832_v23 = vpack.c.bf16 %v3051_v3, %v3050_v60  ;;  %v3242_v15 = vadd.f32 %v3241_v22, %v3051_v3  ;;  %v3280_v21 = vmul.f32 %v3051_v3, %v3051_v3  ;;  %v4191_v62 = vpop.f32.mrb[24].mxu1 }
 0x218   : > { %v2960_v33 = vpop.f32.mrb[25].mxu0  ;;  %3869 = vst [vmem:[%s5703_s26 + $0x58] sm:$0xff] %v3837_v59   ;;  %v4359_v8 = vadd.f32 %v4327_v39, %v4191_v62  ;;  %v2078_v57 = vpop.f32.mrb[25].mxu1 }
 0x219   : > { %v4328_v56 = vpop.f32.mrb[26].mxu0  ;;  %3868 = vst [vmem:[%s5703_s26 + $0x50] sm:$0xff] %v3832_v23   ;;  %v3243_v5 = vadd.f32 %v3242_v15, %v3052_v10  ;;  %v3311_v13 = vadd.f32 %v3310_v19, %v3280_v21  ;;  %v4360_v41 = vadd.f32 %v2960_v33, %v2078_v57  ;;  %v4192_v26 = vpop.f32.mrb[26].mxu1 }
 0x21a   : > { %v2963_v31 = vpop.f32.mrb[27].mxu0  ;;  %v4361_v0 = vadd.f32 %v4328_v56, %v4192_v26  ;;  %v2081_v52 = vpop.f32.mrb[27].mxu1  ;;  %v3056_v37 = vadd.f32 %v4359_v8, %v5694_v55 }
 0x21b   : > { %v3312_v44 = vadd.f32 %v3311_v13, %v3281_v6  ;;  %v3054_v17 = vadd.f32 %v4360_v41, %v5694_v55  ;;  %v3244_v46 = vadd.f32 %v3243_v5, %v3053_v9  ;;  %v4362_v27 = vadd.f32 %v2963_v31, %v2081_v52 }
 0x21c   : > { %v3057_v58 = vadd.f32 %v4361_v0, %v5694_v55  ;;  %v3285_v20 = vmul.f32 %v3056_v37, %v3056_v37 }
 0x21d   : > { %v3245_v43 = vadd.f32 %v3244_v46, %v3054_v17  ;;  %v3283_v38 = vmul.f32 %v3054_v17, %v3054_v17  ;;  %v3313_v25 = vadd.f32 %v3312_v44, %v3282_v28  ;;  %v3055_v51 = vadd.f32 %v4362_v27, %v5694_v55 }
 0x21e   : > { %v3847_v2 = vpack.c.bf16 %v3057_v58, %v3056_v37  ;;  %v3286_v14 = vmul.f32 %v3057_v58, %v3057_v58 }
 0x21f   : > { %v4331_v63 = vpop.f32.mrb[28].mxu0  ;;  %v3314_v11 = vadd.f32 %v3313_v25, %v3283_v38  ;;  %v3842_v4 = vpack.c.bf16 %v3055_v51, %v3054_v17  ;;  %v3246_v24 = vadd.f32 %v3245_v43, %v3055_v51  ;;  %v3284_v45 = vmul.f32 %v3055_v51, %v3055_v51  ;;  %v4195_v53 = vpop.f32.mrb[28].mxu1 }
 0x220   : > { %v2976_v49 = vpop.f32.mrb[29].mxu0  ;;  %3871 = vst [vmem:[%s5703_s26 + $0x68] sm:$0xff] %v3847_v2   ;;  %v4363_v48 = vadd.f32 %v4331_v63, %v4195_v53  ;;  %v2094_v34 = vpop.f32.mrb[29].mxu1 }
 0x221   : > { %v4332_v50 = vpop.f32.mrb[30].mxu0  ;;  %3870 = vst [vmem:[%s5703_s26 + $0x60] sm:$0xff] %v3842_v4   ;;  %v3247_v1 = vadd.f32 %v3246_v24, %v3056_v37  ;;  %v3315_v12 = vadd.f32 %v3314_v11, %v3284_v45  ;;  %v4364_v61 = vadd.f32 %v2976_v49, %v2094_v34  ;;  %v4196_v30 = vpop.f32.mrb[30].mxu1 }
 0x222   : > { %v2979_v36 = vpop.f32.mrb[31].mxu0  ;;  %v4365_v47 = vadd.f32 %v4332_v50, %v4196_v30  ;;  %v2097_v54 = vpop.f32.mrb[31].mxu1  ;;  %v3060_v60 = vadd.f32 %v4363_v48, %v5694_v55 }
 0x223   : > { %v3316_v7 = vadd.f32 %v3315_v12, %v3285_v20  ;;  %v3058_v42 = vadd.f32 %v4364_v61, %v5694_v55  ;;  %v3248_v32 = vadd.f32 %v3247_v1, %v3057_v58  ;;  %v4366_v40 = vadd.f32 %v2979_v36, %v2097_v54 }
 0x224   : > { %v3061_v18 = vadd.f32 %v4365_v47, %v5694_v55  ;;  %v3289_v19 = vmul.f32 %v3060_v60, %v3060_v60 }
 0x225   : > { %v3249_v29 = vadd.f32 %v3248_v32, %v3058_v42  ;;  %v3287_v10 = vmul.f32 %v3058_v42, %v3058_v42  ;;  %v3317_v9 = vadd.f32 %v3316_v7, %v3286_v14  ;;  %v3059_v22 = vadd.f32 %v4366_v40, %v5694_v55 }
 0x226   : > { %v3857_v16 = vpack.c.bf16 %v3061_v18, %v3060_v60  ;;  %v3290_v21 = vmul.f32 %v3061_v18, %v3061_v18 }
 0x227   : > { %v3318_v35 = vadd.f32 %v3317_v9, %v3287_v10  ;;  %v3852_v3 = vpack.c.bf16 %v3059_v22, %v3058_v42  ;;  %v3250_v59 = vadd.f32 %v3249_v29, %v3059_v22  ;;  %v3288_v39 = vmul.f32 %v3059_v22, %v3059_v22 }
 0x228   : > { %3873 = vst [vmem:[%s5703_s26 + $0x78] sm:$0xff] %v3857_v16  }
 0x229   : > { %3872 = vst [vmem:[%s5703_s26 + $0x70] sm:$0xff] %v3852_v3   ;;  %v3251_v23 = vadd.f32 %v3250_v59, %v3060_v60  ;;  %v3319_v15 = vadd.f32 %v3318_v35, %v3288_v39 }
 0x22b   : > { %v3252_v62 = vadd.f32 %v3251_v23, %v3061_v18  ;;  %v3320_v33 = vadd.f32 %v3319_v15, %v3289_v19 }
 0x22d   : > { %v3253_v8 = vrot.slane %v3252_v62, 4  ;;  %v3321_v57 = vadd.f32 %v3320_v33, %v3290_v21 }
 0x22f   : > { %v3254_v56 = vadd.f32 %v3253_v8, %v3252_v62  ;;  %v3322_v6 = vrot.slane %v3321_v57, 4 }
 0x231   : > { %v3255_v5 = vrot.slane %v3254_v56, 2  ;;  %v3323_v55 = vadd.f32 %v3322_v6, %v3321_v57 }
 0x233   : > { %v3256_v13 = vadd.f32 %v3255_v5, %v3254_v56  ;;  %v3324_v41 = vrot.slane %v3323_v55, 2 }
 0x235   : > { %v3257_v26 = vrot.slane %v3256_v13, 1  ;;  %v3325_v31 = vadd.f32 %v3324_v41, %v3323_v55 }
 0x237   : > { %v3326_v28 = vrot.slane %v3325_v31, 1  ;;  %v3258_v0 = vadd.f32 %v3257_v26, %v3256_v13 }
 0x239   : > { %v3327_v52 = vadd.f32 %v3326_v28, %v3325_v31 }
 0x23b   : > { %v3329_v44 = vsel %vm3328_vm8, %v3258_v0, %v3327_v52 }
 0x23c   : > { %3330 = vst [vmem:[%s251_s30] sm:$0x3] %v3329_v44 }
 0x23d PF: > { %s15_s17 = sadd.s32 1, %s4679_s17   ;;  %s5849_s15 = smov %s4675_s16 }
 0x23e   : > { %p12_p5 = scmp.ge.s32.totalorder %s15_s17, 4   ;;  %s5850_s16 = smov %s5852_s18 }
 0x240   :  { %14 = sbr.rel (!%p12_p5) target bundleno = 2 (0x2), region = 82 }

</bundles_post_ra>
